<compile_context>
chip_gen: v5e
topology: v5e:2x2
jax: 0.10.0
libtpu: 0.0.40
codegen_flags: <defaults>
</compile_context>

<pallas_src>
import math

import numpy as np

import jax
import jax.numpy as jnp
from jax import lax
from jax.experimental import pallas as pl
from jax.experimental.pallas import tpu as pltpu

_EPS = 1e-7


def _round_up(v, m):
    return ((v + m - 1) // m) * m


# ------------------------------- kernel -------------------------------------
def _stft_loss_kernel(xyf_ref, basis_ref, out_ref,
                      acc_sq_ref, acc_y_ref, acc_log_ref):
    """One row-tile step: fused STFT matmul (x|y interleaved) + accumulation.

    out_ref (SMEM, shape (3,)), written only at the last grid step:
      [0] sum((y_mag - x_mag)^2)     -> spectral-convergence numerator^2
      [1] sum(y_mag^2)               -> SC denominator^2 (eps of padding
                                        corrected analytically outside)
      [2] sum(|log y_mag - log x_mag|)
    """
    i = pl.program_id(0)

    @pl.when(i == 0)
    def _():
        acc_sq_ref[...] = jnp.zeros_like(acc_sq_ref)
        acc_y_ref[...] = jnp.zeros_like(acc_y_ref)
        acc_log_ref[...] = jnp.zeros_like(acc_log_ref)

    fpad = basis_ref.shape[1] // 2          # static, multiple of 128
    tm = xyf_ref.shape[0] // 2              # static, multiple of 8

    # Single fused MXU matmul per step: [x_tile; y_tile] @ [cos|sin basis].
    z = jnp.dot(xyf_ref[...], basis_ref[...],
                preferred_element_type=jnp.float32)    # (2*tm, 2*fpad) f32

    xz = z[:tm]                              # sublane-aligned static slices
    yz = z[tm:]
    xr, xi = xz[:, :fpad], xz[:, fpad:]      # lane-aligned static slices
    yr, yi = yz[:, :fpad], yz[:, fpad:]

    x_sq = jnp.maximum(xr * xr + xi * xi, _EPS)   # = x_mag^2 (clamped)
    y_sq = jnp.maximum(yr * yr + yi * yi, _EPS)   # = y_mag^2 (clamped)

    # Cancellation/overflow-safe (y_mag - x_mag)^2.
    x_mag = jnp.sqrt(x_sq)
    y_mag = jnp.sqrt(y_sq)
    d = y_mag - x_mag
    # |log y_mag - log x_mag| = 0.5 * |log y_sq - log x_sq| (no extra sqrt).
    logdiff = 0.5 * jnp.abs(jnp.log(y_sq) - jnp.log(x_sq))

    # Deferred reduction: pure VPU elementwise accumulation per step.
    acc_sq_ref[...] += d * d
    acc_y_ref[...] += y_sq
    acc_log_ref[...] += logdiff

    @pl.when(i == pl.num_programs(0) - 1)
    def _():
        out_ref[0] = jnp.sum(acc_sq_ref[...])
        out_ref[1] = jnp.sum(acc_y_ref[...])
        out_ref[2] = jnp.sum(acc_log_ref[...])


# --------------------------- VMEM / tile sizing ------------------------------
def _vmem_capacity_bytes():
    try:
        info = pltpu.get_tpu_info()
        cap = getattr(info, "vmem_capacity_bytes", None)
        if cap:
            return int(cap)
    except Exception:
        pass
    return 128 * 1024 * 1024


def _pick_tm_and_vmem(n_rows, k_pad, npad):
    """Largest row tile (multiple of 8) fitting a generation-aware VMEM budget."""
    cap = _vmem_capacity_bytes()
    if cap >= 96 * 1024 * 1024:          # v5e / v6e: 128 MiB VMEM
        budget, limit_cap, tm_max = 64 << 20, 96 << 20, 512
    else:                                 # v7x: 64 MiB VMEM per TensorCore
        budget, limit_cap, tm_max = 24 << 20, 40 << 20, 256
    fpad = npad // 2

    def est(tm):
        frames = 2 * (2 * tm) * k_pad * 2   # interleaved x|y tile, dbl-buffered, bf16
        basis = k_pad * npad * 2            # constant basis, single-buffered, bf16
        acc = 3 * tm * fpad * 4             # deferred-reduction accumulators (f32)
        zres = (2 * tm) * npad * 4          # matmul result (f32)
        temps = 8 * tm * fpad * 4           # elementwise temporaries (f32)
        return frames + basis + acc + zres + temps

    tm = min(tm_max, _round_up(max(n_rows, 1), 8))
    while tm > 8 and est(tm) > budget:
        tm -= 8
    limit = int(min(max(est(tm) * 1.5, 32 << 20), limit_cap))
    return tm, limit


def _single_res_sums(xy, basis, tm, vmem_limit):
    rows2, k_pad = xy.shape
    npad = basis.shape[1]
    fpad = npad // 2
    grid = (rows2 // (2 * tm),)

    def build(basis_spec):
        return pl.pallas_call(
            _stft_loss_kernel,
            out_shape=jax.ShapeDtypeStruct((3,), jnp.float32),
            grid=grid,
            in_specs=[
                pl.BlockSpec((2 * tm, k_pad), lambda i: (i, 0)),
                basis_spec,
            ],
            out_specs=pl.BlockSpec(memory_space=pltpu.SMEM),
            scratch_shapes=[
                pltpu.VMEM((tm, fpad), jnp.float32),
                pltpu.VMEM((tm, fpad), jnp.float32),
                pltpu.VMEM((tm, fpad), jnp.float32),
            ],
            compiler_params=pltpu.CompilerParams(
                dimension_semantics=("arbitrary",),
                vmem_limit_bytes=vmem_limit),
        )

    try:
        # Constant index_map -> single-buffer the basis (double-buffering a
        # constant operand is pure VMEM waste).
        spec = pl.BlockSpec((k_pad, npad), lambda i: (0, 0),
                            pipeline_mode=pl.Buffered(1))
        out = build(spec)(xy, basis)
        jax.block_until_ready(out)   # surface any rejection of Buffered(1)
        return out
    except Exception:
        # Fallback: default (double-buffered) constant basis.
        spec = pl.BlockSpec((k_pad, npad), lambda i: (0, 0))
        return build(spec)(xy, basis)


# ------------------------- host-side basis constants -------------------------
def _hann_window_np(win_length):
    # torch.hann_window default (periodic=True): 0.5 - 0.5*cos(2*pi*n/N)
    n = np.arange(win_length, dtype=np.float64)
    return 0.5 - 0.5 * np.cos(2.0 * math.pi * n / win_length)


def _dft_basis_np(n_fft, win_length):
    """Windowed real-DFT basis (window zero-padded & centered like torch.stft)."""
    win = _hann_window_np(win_length)
    left = (n_fft - win_length) // 2
    win = np.pad(win, (left, n_fft - win_length - left))
    n_freq = n_fft // 2 + 1
    n = np.arange(n_fft, dtype=np.float64)[:, None]
    k = np.arange(n_freq, dtype=np.float64)[None, :]
    ang = 2.0 * math.pi * n * k / n_fft
    cos_b = (win[:, None] * np.cos(ang)).astype(np.float32)
    sin_b = (-win[:, None] * np.sin(ang)).astype(np.float32)
    return cos_b, sin_b


def _fused_basis_np(n_fft, win_length, k_pad, n_freq_pad):
    """cos|sin basis concatenated along lanes, zero-padded to (k_pad, 2*F_pad)."""
    cos_b, sin_b = _dft_basis_np(n_fft, win_length)
    n_freq = cos_b.shape[1]
    pad = ((0, k_pad - n_fft), (0, n_freq_pad - n_freq))
    return np.concatenate([np.pad(cos_b, pad), np.pad(sin_b, pad)], axis=1)


# ----------------------------- JAX glue -------------------------------------
def _frames(x, n_fft, hop):
    """Centered, reflect-padded framing identical to torch.stft(center=True)."""
    b, _ = x.shape
    pad = n_fft // 2
    xp = jnp.pad(x, ((0, 0), (pad, pad)), mode="reflect")
    length = xp.shape[1]
    n_frames = 1 + (length - n_fft) // hop
    if n_fft % hop == 0:
        # Hop-strided chunk slices + concat: no gather HLO.
        c = n_fft // hop
        chunks = xp[:, :(n_frames + c - 1) * hop].reshape(b, n_frames + c - 1, hop)
        parts = [chunks[:, k:k + n_frames, :] for k in range(c)]
        fr = jnp.concatenate(parts, axis=-1)          # (B, n_frames, n_fft)
    else:
        # TODO(synk): general-hop fallback still uses an XLA gather.
        idx = hop * jnp.arange(n_frames)[:, None] + jnp.arange(n_fft)[None, :]
        fr = xp[:, idx]                               # (B, n_frames, n_fft)
    return fr.reshape(b * n_frames, n_fft), n_frames


def multi_resolution_stft_loss(x, y,
                               fft_sizes, hop_sizes, win_lengths,
                               factor_sc=0.1, factor_mag=0.1):
    sc_total = 0.0
    mag_total = 0.0
    for n_fft, hop, wl in zip(fft_sizes, hop_sizes, win_lengths):
        n_freq = n_fft // 2 + 1
        # Don't pad K for sub-128 FFTs (block last dim == array dim is legal).
        k_pad = n_fft if n_fft < 128 else _round_up(n_fft, 128)
        n_freq_pad = _round_up(n_freq, 128)
        npad = 2 * n_freq_pad

        xf, _ = _frames(x, n_fft, hop)
        yf, _ = _frames(y, n_fft, hop)
        n_rows = xf.shape[0]

        tm, vmem_limit = _pick_tm_and_vmem(n_rows, k_pad, npad)
        rows_p = _round_up(n_rows, tm)
        ntiles = rows_p // tm

        xf = jnp.pad(xf, ((0, rows_p - n_rows), (0, k_pad - n_fft)))
        yf = jnp.pad(yf, ((0, rows_p - n_rows), (0, k_pad - n_fft)))
        # Interleave row tiles as [x_tile0; y_tile0; x_tile1; ...] and cast to
        # bf16 so the kernel does one fused MXU matmul per step.
        xy = jnp.concatenate(
            [xf.reshape(ntiles, tm, k_pad), yf.reshape(ntiles, tm, k_pad)],
            axis=1).reshape(ntiles * 2 * tm, k_pad).astype(jnp.bfloat16)

        basis = jnp.asarray(_fused_basis_np(n_fft, wl, k_pad, n_freq_pad),
                            dtype=jnp.bfloat16)

        sums = _single_res_sums(xy, basis, tm, vmem_limit)

        # Padded rows / padded frequency columns each contribute exactly the
        # clamp value eps to sum(y_mag^2); subtract analytically (zeros stay
        # exactly zero under the bf16 cast).
        pad_count = rows_p * n_freq_pad - n_rows * n_freq
        sum_y_sq = sums[1] - jnp.float32(_EPS) * jnp.float32(pad_count)

        sc = jnp.sqrt(sums[0]) / jnp.sqrt(sum_y_sq)       # Frobenius ratio
        mag = sums[2] / (n_rows * n_freq)                 # L1 mean of log diffs
        sc_total = sc_total + sc
        mag_total = mag_total + mag

    nres = len(fft_sizes)
    return factor_sc * (sc_total / nres) + factor_mag * (mag_total / nres)


def _reference_loss(x, y, fft_sizes, hop_sizes, win_lengths,
                    factor_sc=0.1, factor_mag=0.1):
    """Pure-JAX reference (same math, no Pallas, f32 HIGHEST precision)."""
    sc_total = 0.0
    mag_total = 0.0
    for n_fft, hop, wl in zip(fft_sizes, hop_sizes, win_lengths):
        xf, _ = _frames(x, n_fft, hop)
        yf, _ = _frames(y, n_fft, hop)
        cos_np, sin_np = _dft_basis_np(n_fft, wl)
        cos_b = jnp.asarray(cos_np, dtype=jnp.float32)
        sin_b = jnp.asarray(sin_np, dtype=jnp.float32)

        def mag_of(f):
            r = jnp.einsum("rn,nk->rk", f, cos_b,
                           precision=lax.Precision.HIGHEST)
            im = jnp.einsum("rn,nk->rk", f, sin_b,
                            precision=lax.Precision.HIGHEST)
            return jnp.sqrt(jnp.maximum(r * r + im * im, _EPS))

        xm, ym = mag_of(xf), mag_of(yf)
        sc_total = sc_total + jnp.sqrt(jnp.sum((ym - xm) ** 2)) / jnp.sqrt(
            jnp.sum(ym ** 2))
        mag_total = mag_total + jnp.mean(jnp.abs(jnp.log(ym) - jnp.log(xm)))
    n = len(fft_sizes)
    return factor_sc * sc_total / n + factor_mag * mag_total / n


if __name__ == "__main__":
    key = jax.random.PRNGKey(0)
    kx, ky = jax.random.split(key)
    B, T = 2, 512
    x = jax.random.normal(kx, (B, T), dtype=jnp.float32)
    y = jax.random.normal(ky, (B, T), dtype=jnp.float32)

    # Small resolutions consistent with the module structure (fft/hop/win per res).
    fft_sizes = (128, 256, 64)
    hop_sizes = (32, 64, 16)
    win_lengths = (64, 128, 32)

    loss = multi_resolution_stft_loss(x, y, fft_sizes, hop_sizes, win_lengths)
    loss = jax.block_until_ready(loss)

    ref = jax.block_until_ready(
        _reference_loss(x, y, fft_sizes, hop_sizes, win_lengths))
    assert jnp.isfinite(loss), "loss is not finite"
    assert abs(float(loss) - float(ref)) <= 2e-2 * max(1.0, abs(float(ref))), (
        f"mismatch: pallas={float(loss)} ref={float(ref)}")

    print("KERNEL_OK")
</pallas_src>

<mosaic_0001>
module attributes {stable_mosaic.version = 11 : i64} {
  func.func @_stft_loss_kernel(%arg0: i32, %arg1: memref<80x128xbf16, #tpu.memory_space<vmem>>, %arg2: memref<128x256xbf16, #tpu.memory_space<vmem>>, %arg3: memref<3xf32, #tpu.memory_space<smem>>, %arg4: memref<40x128xf32, #tpu.memory_space<vmem>>, %arg5: memref<40x128xf32, #tpu.memory_space<vmem>>, %arg6: memref<40x128xf32, #tpu.memory_space<vmem>>) attributes {dimension_semantics = [#tpu.dimension_semantics<arbitrary>], iteration_bounds = array<i64: 1>, scalar_prefetch = 0 : i64, scratch_operands = 3 : i64, tpu.core_type = #tpu.core_type<tc>, window_params = [{transform_indices = @transform_0, window_bounds = array<i64: 80, 128>}, {pipeline_mode = #tpu.pipeline_mode<synchronous>, transform_indices = @transform_1, window_bounds = array<i64: 128, 256>}, {transform_indices = @transform_2, window_bounds = array<i64: 3>}]} {
    %c0_i32 = arith.constant 0 : i32
    %0 = arith.cmpi eq, %arg0, %c0_i32 : i32
    %1 = arith.extui %0 : i1 to i32
    %c0_i32_0 = arith.constant 0 : i32
    %2 = arith.cmpi ne, %1, %c0_i32_0 : i32
    scf.if %2 {
      %cst_21 = arith.constant 0.000000e+00 : f32
      %44 = vector.broadcast %cst_21 : f32 to vector<40x128xf32>
      %c0_22 = arith.constant 0 : index
      %c0_23 = arith.constant 0 : index
      %45 = vector.load %arg4[%c0_22, %c0_23] : memref<40x128xf32, #tpu.memory_space<vmem>>, vector<40x128xf32>
      tpu.vector_store %arg4[%c0_22, %c0_23], %44 {strides = array<i32>} : memref<40x128xf32, #tpu.memory_space<vmem>>, vector<40x128xf32>,
      %cst_24 = arith.constant 0.000000e+00 : f32
      %46 = vector.broadcast %cst_24 : f32 to vector<40x128xf32>
      %c0_25 = arith.constant 0 : index
      %c0_26 = arith.constant 0 : index
      %47 = vector.load %arg5[%c0_25, %c0_26] : memref<40x128xf32, #tpu.memory_space<vmem>>, vector<40x128xf32>
      tpu.vector_store %arg5[%c0_25, %c0_26], %46 {strides = array<i32>} : memref<40x128xf32, #tpu.memory_space<vmem>>, vector<40x128xf32>,
      %cst_27 = arith.constant 0.000000e+00 : f32
      %48 = vector.broadcast %cst_27 : f32 to vector<40x128xf32>
      %c0_28 = arith.constant 0 : index
      %c0_29 = arith.constant 0 : index
      %49 = vector.load %arg6[%c0_28, %c0_29] : memref<40x128xf32, #tpu.memory_space<vmem>>, vector<40x128xf32>
      tpu.vector_store %arg6[%c0_28, %c0_29], %48 {strides = array<i32>} : memref<40x128xf32, #tpu.memory_space<vmem>>, vector<40x128xf32>,
    } else {
    }
    %c0 = arith.constant 0 : index
    %c0_1 = arith.constant 0 : index
    %3 = vector.load %arg1[%c0, %c0_1] : memref<80x128xbf16, #tpu.memory_space<vmem>>, vector<80x128xbf16>
    %c0_2 = arith.constant 0 : index
    %c0_3 = arith.constant 0 : index
    %4 = vector.load %arg2[%c0_2, %c0_3] : memref<128x256xbf16, #tpu.memory_space<vmem>>, vector<128x256xbf16>
    %cst = arith.constant dense<0.000000e+00> : vector<80x256xf32>
    %5 = tpu.matmul %3, %4, %cst {dimension_numbers = #tpu.dot_dimension_numbers<[1], [0], [0], [1], [0, 0, 1, 1], [], []>} : vector<80x128xbf16>, vector<128x256xbf16>, vector<80x256xf32> -> vector<80x256xf32>
    %6 = vector.extract_strided_slice %5 {offsets = [0, 0], sizes = [40, 256], strides = [1, 1]} : vector<80x256xf32> to vector<40x256xf32>
    %7 = vector.extract_strided_slice %5 {offsets = [40, 0], sizes = [40, 256], strides = [1, 1]} : vector<80x256xf32> to vector<40x256xf32>
    %8 = vector.extract_strided_slice %6 {offsets = [0, 0], sizes = [40, 128], strides = [1, 1]} : vector<40x256xf32> to vector<40x128xf32>
    %9 = vector.extract_strided_slice %6 {offsets = [0, 128], sizes = [40, 128], strides = [1, 1]} : vector<40x256xf32> to vector<40x128xf32>
    %10 = vector.extract_strided_slice %7 {offsets = [0, 0], sizes = [40, 128], strides = [1, 1]} : vector<40x256xf32> to vector<40x128xf32>
    %11 = vector.extract_strided_slice %7 {offsets = [0, 128], sizes = [40, 128], strides = [1, 1]} : vector<40x256xf32> to vector<40x128xf32>
    %12 = arith.mulf %8, %8 : vector<40x128xf32>
    %13 = arith.mulf %9, %9 : vector<40x128xf32>
    %14 = arith.addf %12, %13 : vector<40x128xf32>
    %cst_4 = arith.constant 1.000000e-07 : f32
    %15 = vector.broadcast %cst_4 : f32 to vector<40x128xf32>
    %16 = arith.maximumf %14, %15 : vector<40x128xf32>
    %17 = arith.mulf %10, %10 : vector<40x128xf32>
    %18 = arith.mulf %11, %11 : vector<40x128xf32>
    %19 = arith.addf %17, %18 : vector<40x128xf32>
    %cst_5 = arith.constant 1.000000e-07 : f32
    %20 = vector.broadcast %cst_5 : f32 to vector<40x128xf32>
    %21 = arith.maximumf %19, %20 : vector<40x128xf32>
    %22 = math.sqrt %16 : vector<40x128xf32>
    %23 = math.sqrt %21 : vector<40x128xf32>
    %24 = arith.subf %23, %22 : vector<40x128xf32>
    %25 = math.log %21 : vector<40x128xf32>
    %26 = math.log %16 : vector<40x128xf32>
    %27 = arith.subf %25, %26 : vector<40x128xf32>
    %28 = math.absf %27 : vector<40x128xf32>
    %cst_6 = arith.constant 5.000000e-01 : f32
    %29 = vector.broadcast %cst_6 : f32 to vector<40x128xf32>
    %30 = arith.mulf %29, %28 : vector<40x128xf32>
    %c0_7 = arith.constant 0 : index
    %c0_8 = arith.constant 0 : index
    %31 = vector.load %arg4[%c0_7, %c0_8] : memref<40x128xf32, #tpu.memory_space<vmem>>, vector<40x128xf32>
    %32 = arith.mulf %24, %24 : vector<40x128xf32>
    %33 = arith.addf %31, %32 : vector<40x128xf32>
    %c0_9 = arith.constant 0 : index
    %c0_10 = arith.constant 0 : index
    %34 = vector.load %arg4[%c0_9, %c0_10] : memref<40x128xf32, #tpu.memory_space<vmem>>, vector<40x128xf32>
    tpu.vector_store %arg4[%c0_9, %c0_10], %33 {strides = array<i32>} : memref<40x128xf32, #tpu.memory_space<vmem>>, vector<40x128xf32>,
    %c0_11 = arith.constant 0 : index
    %c0_12 = arith.constant 0 : index
    %35 = vector.load %arg5[%c0_11, %c0_12] : memref<40x128xf32, #tpu.memory_space<vmem>>, vector<40x128xf32>
    %36 = arith.addf %35, %21 : vector<40x128xf32>
    %c0_13 = arith.constant 0 : index
    %c0_14 = arith.constant 0 : index
    %37 = vector.load %arg5[%c0_13, %c0_14] : memref<40x128xf32, #tpu.memory_space<vmem>>, vector<40x128xf32>
    tpu.vector_store %arg5[%c0_13, %c0_14], %36 {strides = array<i32>} : memref<40x128xf32, #tpu.memory_space<vmem>>, vector<40x128xf32>,
    %c0_15 = arith.constant 0 : index
    %c0_16 = arith.constant 0 : index
    %38 = vector.load %arg6[%c0_15, %c0_16] : memref<40x128xf32, #tpu.memory_space<vmem>>, vector<40x128xf32>
    %39 = arith.addf %38, %30 : vector<40x128xf32>
    %c0_17 = arith.constant 0 : index
    %c0_18 = arith.constant 0 : index
    %40 = vector.load %arg6[%c0_17, %c0_18] : memref<40x128xf32, #tpu.memory_space<vmem>>, vector<40x128xf32>
    tpu.vector_store %arg6[%c0_17, %c0_18], %39 {strides = array<i32>} : memref<40x128xf32, #tpu.memory_space<vmem>>, vector<40x128xf32>,
    %c0_i32_19 = arith.constant 0 : i32
    %41 = arith.cmpi eq, %arg0, %c0_i32_19 : i32
    %42 = arith.extui %41 : i1 to i32
    %c0_i32_20 = arith.constant 0 : i32
    %43 = arith.cmpi ne, %42, %c0_i32_20 : i32
    scf.if %43 {
      %c0_21 = arith.constant 0 : index
      %c0_22 = arith.constant 0 : index
      %44 = vector.load %arg4[%c0_21, %c0_22] : memref<40x128xf32, #tpu.memory_space<vmem>>, vector<40x128xf32>
      %45 = vector.shape_cast %44 : vector<40x128xf32> to vector<1x40x128xf32>
      %cst_23 = arith.constant dense<0.000000e+00> : vector<1xf32>
      %46 = vector.multi_reduction <add>, %45, %cst_23 [1, 2] : vector<1x40x128xf32> to vector<1xf32>
      %47 = vector.shape_cast %46 : vector<1xf32> to vector<1x1x1xf32>
      %48 = vector.extract %47[0, 0, 0] : f32 from vector<1x1x1xf32>
      %c0_24 = arith.constant 0 : index
      %49 = memref.load %arg3[%c0_24] : memref<3xf32, #tpu.memory_space<smem>>
      memref.store %48, %arg3[%c0_24] : memref<3xf32, #tpu.memory_space<smem>>
      %c0_25 = arith.constant 0 : index
      %c0_26 = arith.constant 0 : index
      %50 = vector.load %arg5[%c0_25, %c0_26] : memref<40x128xf32, #tpu.memory_space<vmem>>, vector<40x128xf32>
      %51 = vector.shape_cast %50 : vector<40x128xf32> to vector<1x40x128xf32>
      %cst_27 = arith.constant dense<0.000000e+00> : vector<1xf32>
      %52 = vector.multi_reduction <add>, %51, %cst_27 [1, 2] : vector<1x40x128xf32> to vector<1xf32>
      %53 = vector.shape_cast %52 : vector<1xf32> to vector<1x1x1xf32>
      %54 = vector.extract %53[0, 0, 0] : f32 from vector<1x1x1xf32>
      %c1 = arith.constant 1 : index
      %55 = memref.load %arg3[%c1] : memref<3xf32, #tpu.memory_space<smem>>
      memref.store %54, %arg3[%c1] : memref<3xf32, #tpu.memory_space<smem>>
      %c0_28 = arith.constant 0 : index
      %c0_29 = arith.constant 0 : index
      %56 = vector.load %arg6[%c0_28, %c0_29] : memref<40x128xf32, #tpu.memory_space<vmem>>, vector<40x128xf32>
      %57 = vector.shape_cast %56 : vector<40x128xf32> to vector<1x40x128xf32>
      %cst_30 = arith.constant dense<0.000000e+00> : vector<1xf32>
      %58 = vector.multi_reduction <add>, %57, %cst_30 [1, 2] : vector<1x40x128xf32> to vector<1xf32>
      %59 = vector.shape_cast %58 : vector<1xf32> to vector<1x1x1xf32>
      %60 = vector.extract %59[0, 0, 0] : f32 from vector<1x1x1xf32>
      %c2 = arith.constant 2 : index
      %61 = memref.load %arg3[%c2] : memref<3xf32, #tpu.memory_space<smem>>
      memref.store %60, %arg3[%c2] : memref<3xf32, #tpu.memory_space<smem>>
    } else {
    }
    return
  }
  func.func @transform_0(%arg0: i32) -> (i32, i32) {
    %c0_i32 = arith.constant 0 : i32
    %c0_i32_0 = arith.constant 0 : i32
    return %arg0, %c0_i32 : i32, i32
  }
  func.func @transform_1(%arg0: i32) -> (i32, i32) {
    %c0_i32 = arith.constant 0 : i32
    %c0_i32_0 = arith.constant 0 : i32
    %c0_i32_1 = arith.constant 0 : i32
    return %c0_i32, %c0_i32_0 : i32, i32
  }
  func.func @transform_2(%arg0: i32) -> i32 {
    %c0_i32 = arith.constant 0 : i32
    %c0_i32_0 = arith.constant 0 : i32
    return %c0_i32 : i32
  }
}

module attributes {stable_mosaic.version = 11 : i64} {
  func.func @_stft_loss_kernel(%arg0: i32, %arg1: memref<80x128xbf16, #tpu.memory_space<vmem>>, %arg2: memref<128x256xbf16, #tpu.memory_space<vmem>>, %arg3: memref<3xf32, #tpu.memory_space<smem>>, %arg4: memref<40x128xf32, #tpu.memory_space<vmem>>, %arg5: memref<40x128xf32, #tpu.memory_space<vmem>>, %arg6: memref<40x128xf32, #tpu.memory_space<vmem>>) attributes {dimension_semantics = [#tpu.dimension_semantics<arbitrary>], iteration_bounds = array<i64: 1>, scalar_prefetch = 0 : i64, scratch_operands = 3 : i64, tpu.core_type = #tpu.core_type<tc>, window_params = [{transform_indices = @transform_0, window_bounds = array<i64: 80, 128>}, {pipeline_mode = #tpu.pipeline_mode<synchronous>, transform_indices = @transform_1, window_bounds = array<i64: 128, 256>}, {transform_indices = @transform_2, window_bounds = array<i64: 3>}]} {
    %c0_i32 = arith.constant 0 : i32
    %0 = arith.cmpi eq, %arg0, %c0_i32 : i32
    %1 = arith.extui %0 : i1 to i32
    %c0_i32_0 = arith.constant 0 : i32
    %2 = arith.cmpi ne, %1, %c0_i32_0 : i32
    scf.if %2 {
      %cst_21 = arith.constant 0.000000e+00 : f32
      %44 = vector.broadcast %cst_21 : f32 to vector<40x128xf32>
      %c0_22 = arith.constant 0 : index
      %c0_23 = arith.constant 0 : index
      %45 = vector.load %arg4[%c0_22, %c0_23] : memref<40x128xf32, #tpu.memory_space<vmem>>, vector<40x128xf32>
      tpu.vector_store %arg4[%c0_22, %c0_23], %44 {strides = array<i32>} : memref<40x128xf32, #tpu.memory_space<vmem>>, vector<40x128xf32>,
      %cst_24 = arith.constant 0.000000e+00 : f32
      %46 = vector.broadcast %cst_24 : f32 to vector<40x128xf32>
      %c0_25 = arith.constant 0 : index
      %c0_26 = arith.constant 0 : index
      %47 = vector.load %arg5[%c0_25, %c0_26] : memref<40x128xf32, #tpu.memory_space<vmem>>, vector<40x128xf32>
      tpu.vector_store %arg5[%c0_25, %c0_26], %46 {strides = array<i32>} : memref<40x128xf32, #tpu.memory_space<vmem>>, vector<40x128xf32>,
      %cst_27 = arith.constant 0.000000e+00 : f32
      %48 = vector.broadcast %cst_27 : f32 to vector<40x128xf32>
      %c0_28 = arith.constant 0 : index
      %c0_29 = arith.constant 0 : index
      %49 = vector.load %arg6[%c0_28, %c0_29] : memref<40x128xf32, #tpu.memory_space<vmem>>, vector<40x128xf32>
      tpu.vector_store %arg6[%c0_28, %c0_29], %48 {strides = array<i32>} : memref<40x128xf32, #tpu.memory_space<vmem>>, vector<40x128xf32>,
    } else {
    }
    %c0 = arith.constant 0 : index
    %c0_1 = arith.constant 0 : index
    %3 = vector.load %arg1[%c0, %c0_1] : memref<80x128xbf16, #tpu.memory_space<vmem>>, vector<80x128xbf16>
    %c0_2 = arith.constant 0 : index
    %c0_3 = arith.constant 0 : index
    %4 = vector.load %arg2[%c0_2, %c0_3] : memref<128x256xbf16, #tpu.memory_space<vmem>>, vector<128x256xbf16>
    %cst = arith.constant dense<0.000000e+00> : vector<80x256xf32>
    %5 = tpu.matmul %3, %4, %cst {dimension_numbers = #tpu.dot_dimension_numbers<[1], [0], [0], [1], [0, 0, 1, 1], [], []>} : vector<80x128xbf16>, vector<128x256xbf16>, vector<80x256xf32> -> vector<80x256xf32>
    %6 = vector.extract_strided_slice %5 {offsets = [0, 0], sizes = [40, 256], strides = [1, 1]} : vector<80x256xf32> to vector<40x256xf32>
    %7 = vector.extract_strided_slice %5 {offsets = [40, 0], sizes = [40, 256], strides = [1, 1]} : vector<80x256xf32> to vector<40x256xf32>
    %8 = vector.extract_strided_slice %6 {offsets = [0, 0], sizes = [40, 128], strides = [1, 1]} : vector<40x256xf32> to vector<40x128xf32>
    %9 = vector.extract_strided_slice %6 {offsets = [0, 128], sizes = [40, 128], strides = [1, 1]} : vector<40x256xf32> to vector<40x128xf32>
    %10 = vector.extract_strided_slice %7 {offsets = [0, 0], sizes = [40, 128], strides = [1, 1]} : vector<40x256xf32> to vector<40x128xf32>
    %11 = vector.extract_strided_slice %7 {offsets = [0, 128], sizes = [40, 128], strides = [1, 1]} : vector<40x256xf32> to vector<40x128xf32>
    %12 = arith.mulf %8, %8 : vector<40x128xf32>
    %13 = arith.mulf %9, %9 : vector<40x128xf32>
    %14 = arith.addf %12, %13 : vector<40x128xf32>
    %cst_4 = arith.constant 1.000000e-07 : f32
    %15 = vector.broadcast %cst_4 : f32 to vector<40x128xf32>
    %16 = arith.maximumf %14, %15 : vector<40x128xf32>
    %17 = arith.mulf %10, %10 : vector<40x128xf32>
    %18 = arith.mulf %11, %11 : vector<40x128xf32>
    %19 = arith.addf %17, %18 : vector<40x128xf32>
    %cst_5 = arith.constant 1.000000e-07 : f32
    %20 = vector.broadcast %cst_5 : f32 to vector<40x128xf32>
    %21 = arith.maximumf %19, %20 : vector<40x128xf32>
    %22 = math.sqrt %16 : vector<40x128xf32>
    %23 = math.sqrt %21 : vector<40x128xf32>
    %24 = arith.subf %23, %22 : vector<40x128xf32>
    %25 = math.log %21 : vector<40x128xf32>
    %26 = math.log %16 : vector<40x128xf32>
    %27 = arith.subf %25, %26 : vector<40x128xf32>
    %28 = math.absf %27 : vector<40x128xf32>
    %cst_6 = arith.constant 5.000000e-01 : f32
    %29 = vector.broadcast %cst_6 : f32 to vector<40x128xf32>
    %30 = arith.mulf %29, %28 : vector<40x128xf32>
    %c0_7 = arith.constant 0 : index
    %c0_8 = arith.constant 0 : index
    %31 = vector.load %arg4[%c0_7, %c0_8] : memref<40x128xf32, #tpu.memory_space<vmem>>, vector<40x128xf32>
    %32 = arith.mulf %24, %24 : vector<40x128xf32>
    %33 = arith.addf %31, %32 : vector<40x128xf32>
    %c0_9 = arith.constant 0 : index
    %c0_10 = arith.constant 0 : index
    %34 = vector.load %arg4[%c0_9, %c0_10] : memref<40x128xf32, #tpu.memory_space<vmem>>, vector<40x128xf32>
    tpu.vector_store %arg4[%c0_9, %c0_10], %33 {strides = array<i32>} : memref<40x128xf32, #tpu.memory_space<vmem>>, vector<40x128xf32>,
    %c0_11 = arith.constant 0 : index
    %c0_12 = arith.constant 0 : index
    %35 = vector.load %arg5[%c0_11, %c0_12] : memref<40x128xf32, #tpu.memory_space<vmem>>, vector<40x128xf32>
    %36 = arith.addf %35, %21 : vector<40x128xf32>
    %c0_13 = arith.constant 0 : index
    %c0_14 = arith.constant 0 : index
    %37 = vector.load %arg5[%c0_13, %c0_14] : memref<40x128xf32, #tpu.memory_space<vmem>>, vector<40x128xf32>
    tpu.vector_store %arg5[%c0_13, %c0_14], %36 {strides = array<i32>} : memref<40x128xf32, #tpu.memory_space<vmem>>, vector<40x128xf32>,
    %c0_15 = arith.constant 0 : index
    %c0_16 = arith.constant 0 : index
    %38 = vector.load %arg6[%c0_15, %c0_16] : memref<40x128xf32, #tpu.memory_space<vmem>>, vector<40x128xf32>
    %39 = arith.addf %38, %30 : vector<40x128xf32>
    %c0_17 = arith.constant 0 : index
    %c0_18 = arith.constant 0 : index
    %40 = vector.load %arg6[%c0_17, %c0_18] : memref<40x128xf32, #tpu.memory_space<vmem>>, vector<40x128xf32>
    tpu.vector_store %arg6[%c0_17, %c0_18], %39 {strides = array<i32>} : memref<40x128xf32, #tpu.memory_space<vmem>>, vector<40x128xf32>,
    %c0_i32_19 = arith.constant 0 : i32
    %41 = arith.cmpi eq, %arg0, %c0_i32_19 : i32
    %42 = arith.extui %41 : i1 to i32
    %c0_i32_20 = arith.constant 0 : i32
    %43 = arith.cmpi ne, %42, %c0_i32_20 : i32
    scf.if %43 {
      %c0_21 = arith.constant 0 : index
      %c0_22 = arith.constant 0 : index
      %44 = vector.load %arg4[%c0_21, %c0_22] : memref<40x128xf32, #tpu.memory_space<vmem>>, vector<40x128xf32>
      %45 = vector.shape_cast %44 : vector<40x128xf32> to vector<1x40x128xf32>
      %cst_23 = arith.constant dense<0.000000e+00> : vector<1xf32>
      %46 = vector.multi_reduction <add>, %45, %cst_23 [1, 2] : vector<1x40x128xf32> to vector<1xf32>
      %47 = vector.shape_cast %46 : vector<1xf32> to vector<1x1x1xf32>
      %48 = vector.extract %47[0, 0, 0] : f32 from vector<1x1x1xf32>
      %c0_24 = arith.constant 0 : index
      %49 = memref.load %arg3[%c0_24] : memref<3xf32, #tpu.memory_space<smem>>
      memref.store %48, %arg3[%c0_24] : memref<3xf32, #tpu.memory_space<smem>>
      %c0_25 = arith.constant 0 : index
      %c0_26 = arith.constant 0 : index
      %50 = vector.load %arg5[%c0_25, %c0_26] : memref<40x128xf32, #tpu.memory_space<vmem>>, vector<40x128xf32>
      %51 = vector.shape_cast %50 : vector<40x128xf32> to vector<1x40x128xf32>
      %cst_27 = arith.constant dense<0.000000e+00> : vector<1xf32>
      %52 = vector.multi_reduction <add>, %51, %cst_27 [1, 2] : vector<1x40x128xf32> to vector<1xf32>
      %53 = vector.shape_cast %52 : vector<1xf32> to vector<1x1x1xf32>
      %54 = vector.extract %53[0, 0, 0] : f32 from vector<1x1x1xf32>
      %c1 = arith.constant 1 : index
      %55 = memref.load %arg3[%c1] : memref<3xf32, #tpu.memory_space<smem>>
      memref.store %54, %arg3[%c1] : memref<3xf32, #tpu.memory_space<smem>>
      %c0_28 = arith.constant 0 : index
      %c0_29 = arith.constant 0 : index
      %56 = vector.load %arg6[%c0_28, %c0_29] : memref<40x128xf32, #tpu.memory_space<vmem>>, vector<40x128xf32>
      %57 = vector.shape_cast %56 : vector<40x128xf32> to vector<1x40x128xf32>
      %cst_30 = arith.constant dense<0.000000e+00> : vector<1xf32>
      %58 = vector.multi_reduction <add>, %57, %cst_30 [1, 2] : vector<1x40x128xf32> to vector<1xf32>
      %59 = vector.shape_cast %58 : vector<1xf32> to vector<1x1x1xf32>
      %60 = vector.extract %59[0, 0, 0] : f32 from vector<1x1x1xf32>
      %c2 = arith.constant 2 : index
      %61 = memref.load %arg3[%c2] : memref<3xf32, #tpu.memory_space<smem>>
      memref.store %60, %arg3[%c2] : memref<3xf32, #tpu.memory_space<smem>>
    } else {
    }
    return
  }
  func.func @transform_0(%arg0: i32) -> (i32, i32) {
    %c0_i32 = arith.constant 0 : i32
    %c0_i32_0 = arith.constant 0 : i32
    return %arg0, %c0_i32 : i32, i32
  }
  func.func @transform_1(%arg0: i32) -> (i32, i32) {
    %c0_i32 = arith.constant 0 : i32
    %c0_i32_0 = arith.constant 0 : i32
    %c0_i32_1 = arith.constant 0 : i32
    return %c0_i32, %c0_i32_0 : i32, i32
  }
  func.func @transform_2(%arg0: i32) -> i32 {
    %c0_i32 = arith.constant 0 : i32
    %c0_i32_0 = arith.constant 0 : i32
    return %c0_i32 : i32
  }
}

</mosaic_0001>

<bundles_post_ra>
// kernel: tpu_custom_call.1
= control target key start
LH: loop header
LB: loop body
LE: loop exit
PB: predicated region body
PF: predicated region fallthrough
CT: control target
= control target key end

     0   :  { %7 = vsyncpa [#allocation6], 0  ;;  %s1047_s0 = inlined_call_operand.hbm [shape: bf16[80,128], index: 0, kind: input, shape index: {}]   ;;  %s1048_s1 = inlined_call_operand.hbm [shape: bf16[128,256], index: 1, kind: input, shape index: {}]   ;;  %s1049_s2 = inlined_call_operand.hbm [shape: f32[3], index: 2, kind: output, shape index: {}]  }
   0x1   :  { %8 = vsyncpa [#allocation9], 0 }
   0x2   :  { %9 = vsyncpa [#allocation7], 0  ;;  %s14_s11 = sshll.u32 %s1047_s0, 4  ;;  %s837_s12 = smov [#allocation5]   ;;  %s15_s11 = int_to_ptr.hbm [resolvable:$true] %s14_s11 }
   0x3   :  { %s16_s13 = sshll.u32 %s837_s12, 4  ;;  %s27_s16 = sshll.u32 %s1048_s1, 4  ;;  %s17_s13 = int_to_ptr.vmem [resolvable:$true] %s16_s13  ;;  %s28_s16 = int_to_ptr.hbm [resolvable:$true] %s27_s16 }
   0x4   :  { %s838_s17 = smov 64   ;;  %s839_s18 = smov 4  }
   0x5   :  { %22 = dma.hbm_to_vmem [thread:$0]  %s15_s11, 640, %s17_s13, [#allocation6], %s838_s17, %s838_s17, %s839_s18  }
   0x6   :  { %s840_s19 = smov [#allocation8]   ;;  %s841_s21 = smov 128  }
   0x7   :  { %s29_s20 = sshll.u32 %s840_s19, 4  ;;  %s842_s22 = smov 8   ;;  %s30_s20 = int_to_ptr.vmem [resolvable:$true] %s29_s20 }
   0x8   :  { %35 = dma.hbm_to_vmem [thread:$0]  %s28_s16, 2048, %s30_s20, [#allocation9], %s841_s21, %s841_s21, %s842_s22  }
   0x9   :  { %831 = dma.done.wait [#allocation6], 640  }
   0xa   :  { %832 = vsyncadd [#allocation6], 4294966656 }
   0xb   :  { %833 = dma.done.wait [#allocation9], 2048  }
   0xc   :  { %834 = vsyncadd [#allocation9], 4294965248  ;;  %v675_v0 = vld [vmem:[#allocation8 + $0x70] sm:$0xf]  ;;  %v701_v1 = vld [vmem:[#allocation8 + $0x74] sm:$0xf0] }
   0xd   :  { %v700_v2 = vld [vmem:[#allocation8 + $0x74] sm:$0xf]  ;;  %v676_v3 = vor.u32 %v701_v1, %v675_v0  ;;  %v677_v4 = vld [vmem:[#allocation8 + $0x78] sm:$0xf0]  ;;  %v667_v5 = vld [vmem:[#allocation8 + $0x60] sm:$0xf] }
   0xe   :  { %v699_v6 = vld [vmem:[#allocation8 + $0x64] sm:$0xf0]  ;;  %v680_v7 = vor.u32 %v700_v2, %v677_v4  ;;  %v698_v8 = vld [vmem:[#allocation8 + $0x64] sm:$0xf]  ;;  %v669_v9 = vld [vmem:[#allocation8 + $0x68] sm:$0xf0] }
   0xf   :  { %199 = vmatpush.bf16.msra.mxu0 %v676_v3  ;;  %702 = vmatpush.bf16.msra.mxu2 %v676_v3  ;;  %v668_v10 = vor.u32 %v699_v6, %v667_v5  ;;  %v672_v11 = vor.u32 %v698_v8, %v669_v9  ;;  %v659_v12 = vld [vmem:[#allocation8 + $0x50] sm:$0xf]  ;;  %v697_v13 = vld [vmem:[#allocation8 + $0x54] sm:$0xf0]  ;;  %v696_v14 = vld [vmem:[#allocation8 + $0x54] sm:$0xf] }
  0x10   :  { %233 = vmatpush.bf16.msra.mxu1 %v680_v7  ;;  %710 = vmatpush.bf16.msra.mxu3 %v680_v7  ;;  %v661_v15 = vld [vmem:[#allocation8 + $0x58] sm:$0xf0]  ;;  %v660_v16 = vor.u32 %v697_v13, %v659_v12  ;;  %v651_v18 = vld [vmem:[#allocation8 + $0x40] sm:$0xf]  ;;  %v695_v19 = vld [vmem:[#allocation8 + $0x44] sm:$0xf0] }
  0x11   :  { %v664_v17 = vor.u32 %v696_v14, %v661_v15  ;;  %v694_v20 = vld [vmem:[#allocation8 + $0x44] sm:$0xf]  ;;  %v653_v21 = vld [vmem:[#allocation8 + $0x48] sm:$0xf0]  ;;  %v652_v22 = vor.u32 %v695_v19, %v651_v18  ;;  %v643_v24 = vld [vmem:[#allocation8 + $0x30] sm:$0xf] }
  0x12   :  { %v656_v23 = vor.u32 %v694_v20, %v653_v21  ;;  %v693_v25 = vld [vmem:[#allocation8 + $0x34] sm:$0xf0]  ;;  %v692_v26 = vld [vmem:[#allocation8 + $0x34] sm:$0xf]  ;;  %v645_v27 = vld [vmem:[#allocation8 + $0x38] sm:$0xf0] }
  0x13   :  { %200 = vmatpush.bf16.msra.mxu0 %v668_v10  ;;  %703 = vmatpush.bf16.msra.mxu2 %v668_v10  ;;  %v644_v28 = vor.u32 %v693_v25, %v643_v24  ;;  %v648_v29 = vor.u32 %v692_v26, %v645_v27  ;;  %v635_v30 = vld [vmem:[#allocation8 + $0x20] sm:$0xf]  ;;  %v691_v31 = vld [vmem:[#allocation8 + $0x24] sm:$0xf0]  ;;  %v690_v32 = vld [vmem:[#allocation8 + $0x24] sm:$0xf] }
  0x14   :  { %234 = vmatpush.bf16.msra.mxu1 %v672_v11  ;;  %711 = vmatpush.bf16.msra.mxu3 %v672_v11  ;;  %v637_v33 = vld [vmem:[#allocation8 + $0x28] sm:$0xf0]  ;;  %v636_v34 = vor.u32 %v691_v31, %v635_v30  ;;  %v627_v36 = vld [vmem:[#allocation8 + $0x10] sm:$0xf]  ;;  %v689_v37 = vld [vmem:[#allocation8 + $0x14] sm:$0xf0] }
  0x15   :  { %v640_v35 = vor.u32 %v690_v32, %v637_v33  ;;  %v688_v38 = vld [vmem:[#allocation8 + $0x14] sm:$0xf]  ;;  %v629_v39 = vld [vmem:[#allocation8 + $0x18] sm:$0xf0]  ;;  %v628_v40 = vor.u32 %v689_v37, %v627_v36  ;;  %v619_v42 = vld [vmem:[#allocation8] sm:$0xf] }
  0x16   :  { %v632_v41 = vor.u32 %v688_v38, %v629_v39  ;;  %v687_v43 = vld [vmem:[#allocation8 + $0x4] sm:$0xf0]  ;;  %v686_v44 = vld [vmem:[#allocation8 + $0x4] sm:$0xf]  ;;  %v621_v45 = vld [vmem:[#allocation8 + $0x8] sm:$0xf0] }
  0x17   :  { %201 = vmatpush.bf16.msra.mxu0 %v660_v16  ;;  %704 = vmatpush.bf16.msra.mxu2 %v660_v16  ;;  %v620_v46 = vor.u32 %v687_v43, %v619_v42  ;;  %v624_v47 = vor.u32 %v686_v44, %v621_v45  ;;  %v681_v48 = vld [vmem:[#allocation5] sm:$0xff]  ;;  %v683_v49 = vld [vmem:[#allocation5 + $0x10] sm:$0xff]  ;;  %v684_v50 = vld [vmem:[#allocation5 + $0x18] sm:$0xff]  ;;  %s585_s24 = sshll.u32 %s1049_s2, 4  ;;  %s843_s27 = smov [#allocation10]   ;;  %s586_s24 = int_to_ptr.hbm [resolvable:$true] %s585_s24 }
  0x18   :  { %235 = vmatpush.bf16.msra.mxu1 %v664_v17  ;;  %712 = vmatpush.bf16.msra.mxu3 %v664_v17  ;;  %v682_v51 = vld [vmem:[#allocation5 + $0x8] sm:$0xff]  ;;  %v685_v52 = vld [vmem:[#allocation5 + $0x20] sm:$0xff] }
  0x1b   :  { %202 = vmatpush.bf16.msra.mxu0 %v652_v22  ;;  %705 = vmatpush.bf16.msra.mxu2 %v652_v22 }
  0x1c   :  { %236 = vmatpush.bf16.msra.mxu1 %v656_v23  ;;  %713 = vmatpush.bf16.msra.mxu3 %v656_v23 }
  0x1f   :  { %203 = vmatpush.bf16.msra.mxu0 %v644_v28  ;;  %706 = vmatpush.bf16.msra.mxu2 %v644_v28 }
  0x20   :  { %237 = vmatpush.bf16.msra.mxu1 %v648_v29  ;;  %714 = vmatpush.bf16.msra.mxu3 %v648_v29 }
  0x23   :  { %204 = vmatpush.bf16.msra.mxu0 %v636_v34  ;;  %707 = vmatpush.bf16.msra.mxu2 %v636_v34 }
  0x24   :  { %238 = vmatpush.bf16.msra.mxu1 %v640_v35  ;;  %715 = vmatpush.bf16.msra.mxu3 %v640_v35 }
  0x27   :  { %205 = vmatpush.bf16.msra.mxu0 %v628_v40  ;;  %708 = vmatpush.bf16.msra.mxu2 %v628_v40 }
  0x28   :  { %239 = vmatpush.bf16.msra.mxu1 %v632_v41  ;;  %716 = vmatpush.bf16.msra.mxu3 %v632_v41 }
  0x2b   :  { %206 = vmatpush.bf16.msra.mxu0 %v620_v46  ;;  %709 = vmatpush.bf16.msra.mxu2 %v620_v46 }
  0x2c   :  { %240 = vmatpush.bf16.msra.mxu1 %v624_v47  ;;  %717 = vmatpush.bf16.msra.mxu3 %v624_v47 }
  0x2e   :  { %207 = vmatmul.bf16.vlgmr.msra.gmra.mxu0 %v681_v48  ;;  %217 = vmatmul.bf16.vlgmr.msra.gmra.mxu2 %v683_v49 }
  0x2f   :  { %241 = vmatmul.bf16.vlgmr.msra.gmra.mxu1 %v681_v48  ;;  %256 = vmatmul.bf16.vlgmr.msra.gmra.mxu3 %v684_v50 }
  0x3e   :  { %212 = vmatmul.bf16.gmra.mxu0 %v682_v51  ;;  %222 = vmatmul.bf16.gmra.mxu2 %v684_v50 }
  0x3f   :  { %246 = vmatmul.bf16.gmra.mxu1 %v682_v51  ;;  %261 = vmatmul.bf16.gmra.mxu3 %v685_v52 }
  0x4e   :  { %227 = vmatmul.bf16.gmra.mxu2 %v685_v52 }
  0x4f   :  { %251 = vmatmul.bf16.gmra.mxu1 %v683_v49 }
  0xab   :  { %v208_v53 = vpop.f32.mrf.mxu0 }
  0xac   :  { %v267_v54 = vmul.f32 %v208_v53, %v208_v53  ;;  %v242_v55 = vpop.f32.mrf.mxu1 }
  0xad   :  { %v272_v56 = vmul.f32 %v242_v55, %v242_v55 }
  0xaf   :  { %v277_v57 = vadd.f32 %v272_v56, %v267_v54 }
  0xb1   :  { %v865_v58 = vmax.f32 %v277_v57, 1e-07  ;;  %v218_v59 = vpop.f32.mrf.mxu2 }
  0xb2   :  { %v257_v0 = vpop.f32.mrf.mxu3  ;;  %v271_v39 = vmul.f32 %v218_v59, %v218_v59 }
  0xb3   :  { %v210_v60 = vpop.f32.mrf.mxu0  ;;  %731 = vrsqrt.f32 %v865_v58  ;;  %v293_v11 = vmul.f32 %v257_v0, %v257_v0  ;;  %vm314_vm0 = vcmp.eq.f32.partialorder %v865_v58, inf  ;;  %v317_v59 = vand.u32 2147483648, %v865_v58 }
  0xb4   :  { %v268_v61 = vmul.f32 %v210_v60, %v210_v60  ;;  %v244_v62 = vpop.f32.mrf.mxu1  ;;  %vm316_vm1 = vcmp.eq.f32.partialorder %v865_v58, 0.0 }
  0xb5   :  { %v273_v63 = vmul.f32 %v244_v62, %v244_v62 }
  0xb7   :  { %v278_v1 = vadd.f32 %v273_v63, %v268_v61 }
  0xb9   :  { %v868_v2 = vmax.f32 %v278_v1, 1e-07  ;;  %v870_v3 = vpop.f32.mrf.mxu2  ;;  %v732_v4 = vpop.eup %731 }
  0xba   :  { %v308_v9 = vmul.f32 %v732_v4, %v865_v58  ;;  %v259_v12 = vpop.f32.mrf.mxu3  ;;  %v287_v56 = vmul.f32 %v870_v3, %v870_v3 }
  0xbb   :  { %v213_v5 = vpop.f32.mrf.mxu0  ;;  %733 = vrsqrt.f32 %v868_v2  ;;  %v294_v31 = vmul.f32 %v259_v12, %v259_v12  ;;  %vm326_vm2 = vcmp.eq.f32.partialorder %v868_v2, inf  ;;  %v329_v3 = vand.u32 2147483648, %v868_v2 }
  0xbc   :  { %v269_v6 = vmul.f32 %v213_v5, %v213_v5  ;;  %v247_v7 = vpop.f32.mrf.mxu1  ;;  %v309_v17 = vmul.f32 %v732_v4, %v308_v9  ;;  %vm328_vm3 = vcmp.eq.f32.partialorder %v868_v2, 0.0 }
  0xbd   :  { %v274_v8 = vmul.f32 %v247_v7, %v247_v7 }
  0xbe   :  { %v310_v25 = vmul.f32 0.5, %v309_v17 }
  0xbf   :  { %v279_v10 = vadd.f32 %v274_v8, %v269_v6 }
  0xc0   :  { %v311_v34 = vsub.f32 1.5, %v310_v25 }
  0xc1   :  { %v874_v13 = vmax.f32 %v279_v10, 1e-07  ;;  %v223_v14 = vpop.f32.mrf.mxu2  ;;  %v734_v15 = vpop.eup %733 }
  0xc2   :  { %v288_v16 = vmul.f32 %v223_v14, %v223_v14  ;;  %v320_v22 = vmul.f32 %v734_v15, %v868_v2  ;;  %v262_v33 = vpop.f32.mrf.mxu3  ;;  %v312_v42 = vmul.f32 %v732_v4, %v311_v34 }
  0xc3   :  { %v215_v18 = vpop.f32.mrf.mxu0  ;;  %735 = vrsqrt.f32 %v874_v13  ;;  %v295_v46 = vmul.f32 %v262_v33, %v262_v33  ;;  %vm338_vm4 = vcmp.eq.f32.partialorder %v874_v13, inf  ;;  %vm340_vm11 = vcmp.eq.f32.partialorder %v874_v13, 0.0 }
  0xc4   :  { %v298_v19 = vadd.f32 %v293_v11, %v288_v16  ;;  %v270_v20 = vmul.f32 %v215_v18, %v215_v18  ;;  %v249_v21 = vpop.f32.mrf.mxu1  ;;  %v321_v27 = vmul.f32 %v734_v15, %v320_v22  ;;  %v313_v54 = vmul.f32 %v312_v42, %v865_v58 }
  0xc5   :  { %v275_v23 = vmul.f32 %v249_v21, %v249_v21  ;;  %v341_v42 = vand.u32 2147483648, %v874_v13 }
  0xc6   :  { %v878_v24 = vmax.f32 %v298_v19, 1e-07  ;;  %v322_v37 = vmul.f32 0.5, %v321_v27  ;;  %v315_v10 = vsel %vm314_vm0, %v865_v58, %v313_v54 }
  0xc7   :  { %v280_v26 = vadd.f32 %v275_v23, %v270_v20 }
  0xc8   :  { %737 = vrsqrt.f32 %v878_v24  ;;  %v323_v47 = vsub.f32 1.5, %v322_v37  ;;  %v389_v54 = vand.u32 2147483648, %v878_v24  ;;  %vm386_vm5 = vcmp.eq.f32.partialorder %v878_v24, inf }
  0xc9   :  { %v880_v28 = vmax.f32 %v280_v26, 1e-07  ;;  %v225_v29 = vpop.f32.mrf.mxu2  ;;  %v883_v30 = vpop.eup %735  ;;  %739 = vlog2.f32 %v865_v58  ;;  %vm388_vm8 = vcmp.eq.f32.partialorder %v878_v24, 0.0 }
  0xca   :  { %v289_v32 = vmul.f32 %v225_v29, %v225_v29  ;;  %v332_v38 = vmul.f32 %v883_v30, %v874_v13  ;;  %v264_v63 = vpop.f32.mrf.mxu3  ;;  %v324_v1 = vmul.f32 %v734_v15, %v323_v47 }
  0xcb   :  { %741 = vrsqrt.f32 %v880_v28  ;;  %v296_v14 = vmul.f32 %v264_v63, %v264_v63  ;;  %v353_v58 = vand.u32 2147483648, %v880_v28  ;;  %vm350_vm6 = vcmp.eq.f32.partialorder %v880_v28, inf }
  0xcc   :  { %v299_v35 = vadd.f32 %v294_v31, %v289_v32  ;;  %v252_v36 = vpop.f32.mrf.mxu1  ;;  %743 = vlog2.f32 %v868_v2  ;;  %v333_v48 = vmul.f32 %v883_v30, %v332_v38  ;;  %v325_v18 = vmul.f32 %v324_v1, %v868_v2 }
  0xcd   :  { %v276_v40 = vmul.f32 %v252_v36, %v252_v36  ;;  %745 = vlog2.f32 %v878_v24  ;;  %vm352_vm14 = vcmp.eq.f32.partialorder %v880_v28, 0.0 }
  0xce   :  { %v890_v41 = vmax.f32 %v299_v35, 1e-07  ;;  %v893_v43 = vpop.eup %737  ;;  %v334_v4 = vmul.f32 0.5, %v333_v48  ;;  %v327_v36 = vsel %vm326_vm2, %v868_v2, %v325_v18 }
  0xcf   :  { %v281_v44 = vadd.f32 %v276_v40, %v271_v39  ;;  %v740_v45 = vpop.eup %739  ;;  %v380_v51 = vmul.f32 %v893_v43, %v878_v24  ;;  %v951_v40 = vsel %vm316_vm1, %v317_v59, %v315_v10 }
  0xd0   :  { %747 = vlog2.f32 %v890_v41  ;;  %v909_v57 = vmul.f32 0.6931472, %v740_v45  ;;  %v335_v19 = vsub.f32 1.5, %v334_v4  ;;  %vm398_vm7 = vcmp.eq.f32.partialorder %v890_v41, inf }
  0xd1   :  { %v897_v49 = vmax.f32 %v281_v44, 1e-07  ;;  %v228_v50 = vpop.f32.mrf.mxu2  ;;  %749 = vrsqrt.f32 %v890_v41  ;;  %v902_v52 = vpop.eup %741  ;;  %v381_v6 = vmul.f32 %v893_v43, %v380_v51  ;;  %vm400_vm9 = vcmp.eq.f32.partialorder %v890_v41, 0.0 }
  0xd2   :  { %v290_v53 = vmul.f32 %v228_v50, %v228_v50  ;;  %751 = vlog2.f32 %v874_v13  ;;  %v744_v55 = vpop.eup %743  ;;  %v344_v60 = vmul.f32 %v902_v52, %v880_v28  ;;  %v336_v37 = vmul.f32 %v883_v30, %v335_v19 }
  0xd3   :  { %v746_v61 = vpop.eup %745  ;;  %753 = vrsqrt.f32 %v897_v49  ;;  %v445_v9 = vmul.f32 0.6931472, %v744_v55  ;;  %v382_v25 = vmul.f32 0.5, %v381_v6  ;;  %vm362_vm0 = vcmp.eq.f32.partialorder %v897_v49, inf }
  0xd4   :  { %v300_v62 = vadd.f32 %v295_v46, %v290_v53  ;;  %v254_v0 = vpop.f32.mrf.mxu1  ;;  %v345_v11 = vmul.f32 %v902_v52, %v344_v60  ;;  %v435_v16 = vmul.f32 0.6931472, %v746_v61  ;;  %755 = vlog2.f32 %v880_v28 }
  0xd5   :  { %v292_v5 = vmul.f32 %v254_v0, %v254_v0  ;;  %v383_v44 = vsub.f32 1.5, %v382_v25  ;;  %v959_v53 = vsel %vm328_vm3, %v329_v3, %v327_v36  ;;  %v337_v59 = vmul.f32 %v336_v37, %v874_v13 }
  0xd6   :  { %v748_v7 = vpop.eup %747  ;;  %v919_v8 = vmax.f32 %v300_v62, 1e-07  ;;  %v346_v29 = vmul.f32 0.5, %v345_v11  ;;  %v453_v33 = vsub.f32 %v435_v16, %v445_v9  ;;  %vm364_vm1 = vcmp.eq.f32.partialorder %v897_v49, 0.0 }
  0xd7   :  { %v926_v12 = vpop.eup %749  ;;  %v297_v15 = vadd.f32 %v292_v5, %v287_v56  ;;  %v437_v23 = vmul.f32 0.6931472, %v748_v7  ;;  %v384_v2 = vmul.f32 %v893_v43, %v383_v44 }
  0xd8   :  { %v752_v17 = vpop.eup %751  ;;  %757 = vlog2.f32 %v919_v8  ;;  %v392_v20 = vmul.f32 %v926_v12, %v890_v41  ;;  %v347_v47 = vsub.f32 1.5, %v346_v29  ;;  %v458_v30 = vand.u32 2147483647, %v453_v33 }
  0xd9   :  { %v933_v21 = vmax.f32 %v297_v15, 1e-07  ;;  %v230_v22 = vpop.f32.mrf.mxu2  ;;  %759 = vrsqrt.f32 %v919_v8  ;;  %v936_v26 = vpop.eup %753  ;;  %v447_v32 = vmul.f32 0.6931472, %v752_v17  ;;  %v385_v17 = vmul.f32 %v384_v2, %v878_v24 }
  0xda   :  { %v291_v27 = vmul.f32 %v230_v22, %v230_v22  ;;  %761 = vlog2.f32 %v897_v49  ;;  %v393_v31 = vmul.f32 %v926_v12, %v392_v20  ;;  %v356_v34 = vmul.f32 %v936_v26, %v897_v49  ;;  %v756_v38 = vpop.eup %755 }
  0xdb   :  { %763 = vlog2.f32 %v933_v21  ;;  %v454_v39 = vsub.f32 %v437_v23, %v447_v32  ;;  %v449_v62 = vmul.f32 0.6931472, %v756_v38  ;;  %v348_v5 = vmul.f32 %v902_v52, %v347_v47 }
  0xdc   :  { %v301_v35 = vadd.f32 %v296_v14, %v291_v27  ;;  %765 = vrsqrt.f32 %v933_v21  ;;  %v357_v48 = vmul.f32 %v936_v26, %v356_v34  ;;  %v394_v50 = vmul.f32 0.5, %v393_v31 }
  0xdd   :  { %v459_v63 = vand.u32 2147483647, %v454_v39  ;;  %v463_v6 = vmul.f32 0.5, %v458_v30  ;;  %v339_v52 = vsel %vm338_vm4, %v874_v13, %v337_v59  ;;  %v401_v14 = vand.u32 2147483648, %v890_v41 }
  0xde   :  { %v758_v45 = vpop.eup %757  ;;  %v954_v46 = vmax.f32 %v301_v35, 1e-07  ;;  %v395_v60 = vsub.f32 1.5, %v394_v50  ;;  %v358_v3 = vmul.f32 0.5, %v357_v48  ;;  %v349_v22 = vmul.f32 %v348_v5, %v880_v28 }
  0xdf   :  { %v760_v51 = vpop.eup %759  ;;  %v439_v56 = vmul.f32 0.6931472, %v758_v45  ;;  %vm374_vm10 = vcmp.eq.f32.partialorder %v933_v21, inf  ;;  %vm376_vm12 = vcmp.eq.f32.partialorder %v933_v21, 0.0  ;;  %v377_v27 = vand.u32 2147483648, %v933_v21 }
  0xe0   :  { %v762_v55 = vpop.eup %761  ;;  %767 = vlog2.f32 %v954_v46  ;;  %v404_v0 = vmul.f32 %v760_v51, %v919_v8  ;;  %v396_v9 = vmul.f32 %v926_v12, %v395_v60  ;;  %v464_v12 = vmul.f32 0.5, %v459_v63 }
  0xe1   :  { %v764_v61 = vpop.eup %763  ;;  %769 = vrsqrt.f32 %v954_v46  ;;  %v455_v11 = vsub.f32 %v439_v56, %v449_v62  ;;  %v451_v15 = vmul.f32 0.6931472, %v762_v55  ;;  %vm410_vm13 = vcmp.eq.f32.partialorder %v919_v8, inf }
  0xe2   :  { %v766_v1 = vpop.eup %765  ;;  %v433_v4 = vmul.f32 0.6931472, %v764_v61  ;;  %v405_v10 = vmul.f32 %v760_v51, %v404_v0  ;;  %v397_v29 = vmul.f32 %v396_v9, %v890_v41  ;;  %v387_v37 = vsel %vm386_vm5, %v878_v24, %v385_v17 }
  0xe3   :  { %v368_v7 = vmul.f32 %v766_v1, %v933_v21  ;;  %v460_v32 = vand.u32 2147483647, %v455_v11  ;;  %v351_v44 = vsel %vm350_vm6, %v880_v28, %v349_v22  ;;  %v390_v60 = vsel %vm388_vm8, %v389_v54, %v387_v37 }
  0xe4   :  { %v452_v43 = vsub.f32 %v433_v4, %v909_v57  ;;  %v406_v18 = vmul.f32 0.5, %v405_v10  ;;  %v359_v57 = vsub.f32 1.5, %v358_v3  ;;  %v399_v30 = vsel %vm398_vm7, %v890_v41, %v397_v29 }
  0xe5   :  { %v369_v16 = vmul.f32 %v766_v1, %v368_v7  ;;  %v465_v56 = vmul.f32 0.5, %v460_v32  ;;  %vm412_vm15 = vcmp.eq.f32.partialorder %v919_v8, 0.0  ;;  %v428_v3 = vsub.f32 %v390_v60, %v959_v53 }
  0xe6   :  { %v768_v19 = vpop.eup %767  ;;  %v457_v20 = vand.u32 2147483647, %v452_v43  ;;  %v407_v34 = vsub.f32 1.5, %v406_v18  ;;  %v360_v45 = vmul.f32 %v936_v26, %v359_v57  ;;  %v342_v7 = vsel %vm340_vm11, %v341_v42, %v339_v52 }
  0xe7   :  { %v441_v23 = vmul.f32 0.6931472, %v768_v19  ;;  %v370_v25 = vmul.f32 0.5, %v369_v16  ;;  %v770_v31 = vpop.eup %769  ;;  %v354_v53 = vsel %vm352_vm14, %v353_v58, %v351_v44  ;;  %v473_v16 = vmul.f32 %v428_v3, %v428_v3 }
  0xe8   :  { %v462_v33 = vmul.f32 0.5, %v457_v20  ;;  %v416_v38 = vmul.f32 %v770_v31, %v954_v46  ;;  %v408_v47 = vmul.f32 %v760_v51, %v407_v34  ;;  %v413_v51 = vand.u32 2147483648, %v919_v8 }
  0xe9   :  { %v456_v35 = vsub.f32 %v441_v23, %v451_v15  ;;  %v371_v36 = vsub.f32 1.5, %v370_v25  ;;  %v361_v0 = vmul.f32 %v360_v45, %v897_v49  ;;  %v365_v17 = vand.u32 2147483648, %v897_v49 }
  0xea   :  { %v565_v39 = vadd.f32 %v463_v6, %v462_v33  ;;  %v417_v55 = vmul.f32 %v770_v31, %v416_v38  ;;  %v409_v61 = vmul.f32 %v408_v47, %v919_v8  ;;  %vm422_vm2 = vcmp.eq.f32.partialorder %v954_v46, inf }
  0xeb   :  { %v461_v48 = vand.u32 2147483647, %v456_v35  ;;  %v372_v50 = vmul.f32 %v766_v1, %v371_v36  ;;  %v402_v1 = vsel %vm400_vm9, %v401_v14, %v399_v30  ;;  %v363_v15 = vsel %vm362_vm0, %v897_v49, %v361_v0 }
  0xec   :  { %v566_v59 = vadd.f32 %v565_v39, %v464_v12  ;;  %v418_v63 = vmul.f32 0.5, %v417_v55  ;;  %v411_v4 = vsel %vm410_vm13, %v919_v8, %v409_v61  ;;  %v429_v14 = vsub.f32 %v402_v1, %v342_v7 }
  0xed   :  { %v466_v62 = vmul.f32 0.5, %v461_v48  ;;  %v373_v26 = vmul.f32 %v372_v50, %v933_v21  ;;  %v414_v10 = vsel %vm412_vm15, %v413_v51, %v411_v4  ;;  %vm424_vm3 = vcmp.eq.f32.partialorder %v954_v46, 0.0 }
  0xee   :  { %v567_v2 = vadd.f32 %v566_v59, %v465_v56  ;;  %v419_v5 = vsub.f32 1.5, %v418_v63  ;;  %v430_v42 = vsub.f32 %v414_v10, %v354_v53  ;;  %v474_v28 = vmul.f32 %v429_v14, %v429_v14 }
  0xef   :  { %v375_v54 = vsel %vm374_vm10, %v933_v21, %v373_v26  ;;  %v366_v19 = vsel %vm364_vm1, %v365_v17, %v363_v15  ;;  %v545_v23 = vadd.f32 %v878_v24, %v933_v21 }
  0xf0   :  { %v568_v6 = vadd.f32 %v567_v2, %v466_v62  ;;  %v378_v9 = vsel %vm376_vm12, %v377_v27, %v375_v54  ;;  %v420_v43 = vmul.f32 %v770_v31, %v419_v5  ;;  %v475_v22 = vmul.f32 %v430_v42, %v430_v42 }
  0xf1   :  { %v427_v11 = vsub.f32 %v378_v9, %v951_v40  ;;  %v425_v40 = vand.u32 2147483648, %v954_v46  ;;  %v546_v29 = vadd.f32 %v545_v23, %v890_v41 }
  0xf2   :  { %569 = vadd.xlane.f32.xlu1 %v568_v6  ;;  %v421_v13 = vmul.f32 %v420_v43, %v954_v46 }
  0xf3   :  { %v472_v52 = vmul.f32 %v427_v11, %v427_v11  ;;  %v547_v31 = vadd.f32 %v546_v29, %v919_v8 }
  0xf4   :  { %v423_v18 = vsel %vm422_vm2, %v954_v46, %v421_v13 }
  0xf5   :  { %v525_v58 = vadd.f32 %v473_v16, %v472_v52  ;;  %v426_v20 = vsel %vm424_vm3, %v425_v40, %v423_v18  ;;  %v548_v32 = vadd.f32 %v547_v31, %v954_v46 }
  0xf6   :  { %v431_v12 = vsub.f32 %v426_v20, %v366_v19 }
  0xf7   :  { %v526_v57 = vadd.f32 %v525_v58, %v474_v28 }
  0xf8   :  { %v476_v25 = vmul.f32 %v431_v12, %v431_v12 }
  0xf9   :  { %v527_v49 = vadd.f32 %v526_v57, %v475_v22 }
  0xfb   :  { %v528_v27 = vadd.f32 %v527_v49, %v476_v25 }
  0xfd   :  { %529 = vadd.xlane.f32.xlu0 %v528_v27 }
 0x105   :  { %549 = vadd.xlane.f32.xlu0 %v548_v32 }
 0x165   :  { %v570_v33 = vpop.xlane.xlu1 %569 }
 0x166   :  { %v571_v34 = vrot.slane %v570_v33, 4 }
 0x168   :  { %v572_v38 = vadd.f32 %v571_v34, %v570_v33 }
 0x16a   :  { %v573_v24 = vrot.slane %v572_v38, 2 }
 0x16c   :  { %v574_v50 = vadd.f32 %v573_v24, %v572_v38 }
 0x16e   :  { %v575_v46 = vrot.slane %v574_v50, 1 }
 0x170   :  { %v530_v35 = vpop.xlane.xlu0 %529  ;;  %v576_v59 = vadd.f32 %v575_v46, %v574_v50 }
 0x171   :  { %v531_v36 = vrot.slane %v530_v35, 4 }
 0x173   :  { %v532_v37 = vadd.f32 %v531_v36, %v530_v35 }
 0x175   :  { %v533_v39 = vrot.slane %v532_v37, 2 }
 0x177   :  { %v534_v44 = vadd.f32 %v533_v39, %v532_v37 }
 0x178   :  { %v550_v21 = vpop.xlane.xlu0 %549 }
 0x179   :  { %v551_v45 = vrot.slane %v550_v21, 4  ;;  %v535_v47 = vrot.slane %v534_v44, 1 }
 0x17b   :  { %v552_v48 = vadd.f32 %v551_v45, %v550_v21  ;;  %v536_v41 = vadd.f32 %v535_v47, %v534_v44 }
 0x17d   :  { %v553_v30 = vrot.slane %v552_v48, 2  ;;  %718 = vpush %v536_v41 }
 0x17f   :  { %v554_v8 = vadd.f32 %v553_v30, %v552_v48 }
 0x181   :  { %v555_v55 = vrot.slane %v554_v8, 1 }
 0x183   :  { %v556_v56 = vadd.f32 %v555_v55, %v554_v8 }
 0x185   :  { %720 = vpush %v556_v56 }
 0x186   :  { %722 = vpush %v576_v59 }
 0x1ae   :  { %s719_s0 = spop %718 }
 0x1af   :  { %539 = sst [smem:[#allocation10]] %s719_s0 }
 0x1b6   :  { %s721_s25 = spop %720 }
 0x1b7   :  { %559 = sst [smem:[#allocation10 + $0x1]] %s721_s25  ;;  %s723_s26 = spop %722 }
 0x1b8   :  { %579 = sst [smem:[#allocation10 + $0x2]] %s723_s26 }
 0x1b9   :  { %588 = dma.smem_to_hbm %s843_s27, 16, %s586_s24, [#allocation7]  }
 0x1ba   :  { %835 = dma.done.wait [#allocation7], 16  }
 0x1bb   :  { %836 = vsyncadd [#allocation7], 4294967280 }
 0x1bc   :  { %593 = sfence }
 0x1bd   :  { %594 = vsyncpa [#allocation6], 1 }
 0x1be   :  { %595 = vsyncpa [#allocation9], 1 }
 0x1bf   :  { %596 = vsyncpa [#allocation7], 1 }

// kernel: tpu_custom_call.1
= control target key start
LH: loop header
LB: loop body
LE: loop exit
PB: predicated region body
PF: predicated region fallthrough
CT: control target
= control target key end

     0   :  { %7 = vsyncpa [#allocation6], 0  ;;  %s1047_s0 = inlined_call_operand.hbm [shape: bf16[80,128], index: 0, kind: input, shape index: {}]   ;;  %s1048_s1 = inlined_call_operand.hbm [shape: bf16[128,256], index: 1, kind: input, shape index: {}]   ;;  %s1049_s2 = inlined_call_operand.hbm [shape: f32[3], index: 2, kind: output, shape index: {}]  }
   0x1   :  { %8 = vsyncpa [#allocation9], 0 }
   0x2   :  { %9 = vsyncpa [#allocation7], 0  ;;  %s14_s11 = sshll.u32 %s1047_s0, 4  ;;  %s837_s12 = smov [#allocation5]   ;;  %s15_s11 = int_to_ptr.hbm [resolvable:$true] %s14_s11 }
   0x3   :  { %s16_s13 = sshll.u32 %s837_s12, 4  ;;  %s27_s16 = sshll.u32 %s1048_s1, 4  ;;  %s17_s13 = int_to_ptr.vmem [resolvable:$true] %s16_s13  ;;  %s28_s16 = int_to_ptr.hbm [resolvable:$true] %s27_s16 }
   0x4   :  { %s838_s17 = smov 64   ;;  %s839_s18 = smov 4  }
   0x5   :  { %22 = dma.hbm_to_vmem [thread:$0]  %s15_s11, 640, %s17_s13, [#allocation6], %s838_s17, %s838_s17, %s839_s18  }
   0x6   :  { %s840_s19 = smov [#allocation8]   ;;  %s841_s21 = smov 128  }
   0x7   :  { %s29_s20 = sshll.u32 %s840_s19, 4  ;;  %s842_s22 = smov 8   ;;  %s30_s20 = int_to_ptr.vmem [resolvable:$true] %s29_s20 }
   0x8   :  { %35 = dma.hbm_to_vmem [thread:$0]  %s28_s16, 2048, %s30_s20, [#allocation9], %s841_s21, %s841_s21, %s842_s22  }
   0x9   :  { %831 = dma.done.wait [#allocation6], 640  }
   0xa   :  { %832 = vsyncadd [#allocation6], 4294966656 }
   0xb   :  { %833 = dma.done.wait [#allocation9], 2048  }
   0xc   :  { %834 = vsyncadd [#allocation9], 4294965248  ;;  %v675_v0 = vld [vmem:[#allocation8 + $0x70] sm:$0xf]  ;;  %v701_v1 = vld [vmem:[#allocation8 + $0x74] sm:$0xf0] }
   0xd   :  { %v700_v2 = vld [vmem:[#allocation8 + $0x74] sm:$0xf]  ;;  %v676_v3 = vor.u32 %v701_v1, %v675_v0  ;;  %v677_v4 = vld [vmem:[#allocation8 + $0x78] sm:$0xf0]  ;;  %v667_v5 = vld [vmem:[#allocation8 + $0x60] sm:$0xf] }
   0xe   :  { %v699_v6 = vld [vmem:[#allocation8 + $0x64] sm:$0xf0]  ;;  %v680_v7 = vor.u32 %v700_v2, %v677_v4  ;;  %v698_v8 = vld [vmem:[#allocation8 + $0x64] sm:$0xf]  ;;  %v669_v9 = vld [vmem:[#allocation8 + $0x68] sm:$0xf0] }
   0xf   :  { %199 = vmatpush.bf16.msra.mxu0 %v676_v3  ;;  %702 = vmatpush.bf16.msra.mxu2 %v676_v3  ;;  %v668_v10 = vor.u32 %v699_v6, %v667_v5  ;;  %v672_v11 = vor.u32 %v698_v8, %v669_v9  ;;  %v659_v12 = vld [vmem:[#allocation8 + $0x50] sm:$0xf]  ;;  %v697_v13 = vld [vmem:[#allocation8 + $0x54] sm:$0xf0]  ;;  %v696_v14 = vld [vmem:[#allocation8 + $0x54] sm:$0xf] }
  0x10   :  { %233 = vmatpush.bf16.msra.mxu1 %v680_v7  ;;  %710 = vmatpush.bf16.msra.mxu3 %v680_v7  ;;  %v661_v15 = vld [vmem:[#allocation8 + $0x58] sm:$0xf0]  ;;  %v660_v16 = vor.u32 %v697_v13, %v659_v12  ;;  %v651_v18 = vld [vmem:[#allocation8 + $0x40] sm:$0xf]  ;;  %v695_v19 = vld [vmem:[#allocation8 + $0x44] sm:$0xf0] }
  0x11   :  { %v664_v17 = vor.u32 %v696_v14, %v661_v15  ;;  %v694_v20 = vld [vmem:[#allocation8 + $0x44] sm:$0xf]  ;;  %v653_v21 = vld [vmem:[#allocation8 + $0x48] sm:$0xf0]  ;;  %v652_v22 = vor.u32 %v695_v19, %v651_v18  ;;  %v643_v24 = vld [vmem:[#allocation8 + $0x30] sm:$0xf] }
  0x12   :  { %v656_v23 = vor.u32 %v694_v20, %v653_v21  ;;  %v693_v25 = vld [vmem:[#allocation8 + $0x34] sm:$0xf0]  ;;  %v692_v26 = vld [vmem:[#allocation8 + $0x34] sm:$0xf]  ;;  %v645_v27 = vld [vmem:[#allocation8 + $0x38] sm:$0xf0] }
  0x13   :  { %200 = vmatpush.bf16.msra.mxu0 %v668_v10  ;;  %703 = vmatpush.bf16.msra.mxu2 %v668_v10  ;;  %v644_v28 = vor.u32 %v693_v25, %v643_v24  ;;  %v648_v29 = vor.u32 %v692_v26, %v645_v27  ;;  %v635_v30 = vld [vmem:[#allocation8 + $0x20] sm:$0xf]  ;;  %v691_v31 = vld [vmem:[#allocation8 + $0x24] sm:$0xf0]  ;;  %v690_v32 = vld [vmem:[#allocation8 + $0x24] sm:$0xf] }
  0x14   :  { %234 = vmatpush.bf16.msra.mxu1 %v672_v11  ;;  %711 = vmatpush.bf16.msra.mxu3 %v672_v11  ;;  %v637_v33 = vld [vmem:[#allocation8 + $0x28] sm:$0xf0]  ;;  %v636_v34 = vor.u32 %v691_v31, %v635_v30  ;;  %v627_v36 = vld [vmem:[#allocation8 + $0x10] sm:$0xf]  ;;  %v689_v37 = vld [vmem:[#allocation8 + $0x14] sm:$0xf0] }
  0x15   :  { %v640_v35 = vor.u32 %v690_v32, %v637_v33  ;;  %v688_v38 = vld [vmem:[#allocation8 + $0x14] sm:$0xf]  ;;  %v629_v39 = vld [vmem:[#allocation8 + $0x18] sm:$0xf0]  ;;  %v628_v40 = vor.u32 %v689_v37, %v627_v36  ;;  %v619_v42 = vld [vmem:[#allocation8] sm:$0xf] }
  0x16   :  { %v632_v41 = vor.u32 %v688_v38, %v629_v39  ;;  %v687_v43 = vld [vmem:[#allocation8 + $0x4] sm:$0xf0]  ;;  %v686_v44 = vld [vmem:[#allocation8 + $0x4] sm:$0xf]  ;;  %v621_v45 = vld [vmem:[#allocation8 + $0x8] sm:$0xf0] }
  0x17   :  { %201 = vmatpush.bf16.msra.mxu0 %v660_v16  ;;  %704 = vmatpush.bf16.msra.mxu2 %v660_v16  ;;  %v620_v46 = vor.u32 %v687_v43, %v619_v42  ;;  %v624_v47 = vor.u32 %v686_v44, %v621_v45  ;;  %v681_v48 = vld [vmem:[#allocation5] sm:$0xff]  ;;  %v683_v49 = vld [vmem:[#allocation5 + $0x10] sm:$0xff]  ;;  %v684_v50 = vld [vmem:[#allocation5 + $0x18] sm:$0xff]  ;;  %s585_s24 = sshll.u32 %s1049_s2, 4  ;;  %s843_s27 = smov [#allocation10]   ;;  %s586_s24 = int_to_ptr.hbm [resolvable:$true] %s585_s24 }
  0x18   :  { %235 = vmatpush.bf16.msra.mxu1 %v664_v17  ;;  %712 = vmatpush.bf16.msra.mxu3 %v664_v17  ;;  %v682_v51 = vld [vmem:[#allocation5 + $0x8] sm:$0xff]  ;;  %v685_v52 = vld [vmem:[#allocation5 + $0x20] sm:$0xff] }
  0x1b   :  { %202 = vmatpush.bf16.msra.mxu0 %v652_v22  ;;  %705 = vmatpush.bf16.msra.mxu2 %v652_v22 }
  0x1c   :  { %236 = vmatpush.bf16.msra.mxu1 %v656_v23  ;;  %713 = vmatpush.bf16.msra.mxu3 %v656_v23 }
  0x1f   :  { %203 = vmatpush.bf16.msra.mxu0 %v644_v28  ;;  %706 = vmatpush.bf16.msra.mxu2 %v644_v28 }
  0x20   :  { %237 = vmatpush.bf16.msra.mxu1 %v648_v29  ;;  %714 = vmatpush.bf16.msra.mxu3 %v648_v29 }
  0x23   :  { %204 = vmatpush.bf16.msra.mxu0 %v636_v34  ;;  %707 = vmatpush.bf16.msra.mxu2 %v636_v34 }
  0x24   :  { %238 = vmatpush.bf16.msra.mxu1 %v640_v35  ;;  %715 = vmatpush.bf16.msra.mxu3 %v640_v35 }
  0x27   :  { %205 = vmatpush.bf16.msra.mxu0 %v628_v40  ;;  %708 = vmatpush.bf16.msra.mxu2 %v628_v40 }
  0x28   :  { %239 = vmatpush.bf16.msra.mxu1 %v632_v41  ;;  %716 = vmatpush.bf16.msra.mxu3 %v632_v41 }
  0x2b   :  { %206 = vmatpush.bf16.msra.mxu0 %v620_v46  ;;  %709 = vmatpush.bf16.msra.mxu2 %v620_v46 }
  0x2c   :  { %240 = vmatpush.bf16.msra.mxu1 %v624_v47  ;;  %717 = vmatpush.bf16.msra.mxu3 %v624_v47 }
  0x2e   :  { %207 = vmatmul.bf16.vlgmr.msra.gmra.mxu0 %v681_v48  ;;  %217 = vmatmul.bf16.vlgmr.msra.gmra.mxu2 %v683_v49 }
  0x2f   :  { %241 = vmatmul.bf16.vlgmr.msra.gmra.mxu1 %v681_v48  ;;  %256 = vmatmul.bf16.vlgmr.msra.gmra.mxu3 %v684_v50 }
  0x3e   :  { %212 = vmatmul.bf16.gmra.mxu0 %v682_v51  ;;  %222 = vmatmul.bf16.gmra.mxu2 %v684_v50 }
  0x3f   :  { %246 = vmatmul.bf16.gmra.mxu1 %v682_v51  ;;  %261 = vmatmul.bf16.gmra.mxu3 %v685_v52 }
  0x4e   :  { %227 = vmatmul.bf16.gmra.mxu2 %v685_v52 }
  0x4f   :  { %251 = vmatmul.bf16.gmra.mxu1 %v683_v49 }
  0xab   :  { %v208_v53 = vpop.f32.mrf.mxu0 }
  0xac   :  { %v267_v54 = vmul.f32 %v208_v53, %v208_v53  ;;  %v242_v55 = vpop.f32.mrf.mxu1 }
  0xad   :  { %v272_v56 = vmul.f32 %v242_v55, %v242_v55 }
  0xaf   :  { %v277_v57 = vadd.f32 %v272_v56, %v267_v54 }
  0xb1   :  { %v865_v58 = vmax.f32 %v277_v57, 1e-07  ;;  %v218_v59 = vpop.f32.mrf.mxu2 }
  0xb2   :  { %v257_v0 = vpop.f32.mrf.mxu3  ;;  %v271_v39 = vmul.f32 %v218_v59, %v218_v59 }
  0xb3   :  { %v210_v60 = vpop.f32.mrf.mxu0  ;;  %731 = vrsqrt.f32 %v865_v58  ;;  %v293_v11 = vmul.f32 %v257_v0, %v257_v0  ;;  %vm314_vm0 = vcmp.eq.f32.partialorder %v865_v58, inf  ;;  %v317_v59 = vand.u32 2147483648, %v865_v58 }
  0xb4   :  { %v268_v61 = vmul.f32 %v210_v60, %v210_v60  ;;  %v244_v62 = vpop.f32.mrf.mxu1  ;;  %vm316_vm1 = vcmp.eq.f32.partialorder %v865_v58, 0.0 }
  0xb5   :  { %v273_v63 = vmul.f32 %v244_v62, %v244_v62 }
  0xb7   :  { %v278_v1 = vadd.f32 %v273_v63, %v268_v61 }
  0xb9   :  { %v868_v2 = vmax.f32 %v278_v1, 1e-07  ;;  %v870_v3 = vpop.f32.mrf.mxu2  ;;  %v732_v4 = vpop.eup %731 }
  0xba   :  { %v308_v9 = vmul.f32 %v732_v4, %v865_v58  ;;  %v259_v12 = vpop.f32.mrf.mxu3  ;;  %v287_v56 = vmul.f32 %v870_v3, %v870_v3 }
  0xbb   :  { %v213_v5 = vpop.f32.mrf.mxu0  ;;  %733 = vrsqrt.f32 %v868_v2  ;;  %v294_v31 = vmul.f32 %v259_v12, %v259_v12  ;;  %vm326_vm2 = vcmp.eq.f32.partialorder %v868_v2, inf  ;;  %v329_v3 = vand.u32 2147483648, %v868_v2 }
  0xbc   :  { %v269_v6 = vmul.f32 %v213_v5, %v213_v5  ;;  %v247_v7 = vpop.f32.mrf.mxu1  ;;  %v309_v17 = vmul.f32 %v732_v4, %v308_v9  ;;  %vm328_vm3 = vcmp.eq.f32.partialorder %v868_v2, 0.0 }
  0xbd   :  { %v274_v8 = vmul.f32 %v247_v7, %v247_v7 }
  0xbe   :  { %v310_v25 = vmul.f32 0.5, %v309_v17 }
  0xbf   :  { %v279_v10 = vadd.f32 %v274_v8, %v269_v6 }
  0xc0   :  { %v311_v34 = vsub.f32 1.5, %v310_v25 }
  0xc1   :  { %v874_v13 = vmax.f32 %v279_v10, 1e-07  ;;  %v223_v14 = vpop.f32.mrf.mxu2  ;;  %v734_v15 = vpop.eup %733 }
  0xc2   :  { %v288_v16 = vmul.f32 %v223_v14, %v223_v14  ;;  %v320_v22 = vmul.f32 %v734_v15, %v868_v2  ;;  %v262_v33 = vpop.f32.mrf.mxu3  ;;  %v312_v42 = vmul.f32 %v732_v4, %v311_v34 }
  0xc3   :  { %v215_v18 = vpop.f32.mrf.mxu0  ;;  %735 = vrsqrt.f32 %v874_v13  ;;  %v295_v46 = vmul.f32 %v262_v33, %v262_v33  ;;  %vm338_vm4 = vcmp.eq.f32.partialorder %v874_v13, inf  ;;  %vm340_vm11 = vcmp.eq.f32.partialorder %v874_v13, 0.0 }
  0xc4   :  { %v298_v19 = vadd.f32 %v293_v11, %v288_v16  ;;  %v270_v20 = vmul.f32 %v215_v18, %v215_v18  ;;  %v249_v21 = vpop.f32.mrf.mxu1  ;;  %v321_v27 = vmul.f32 %v734_v15, %v320_v22  ;;  %v313_v54 = vmul.f32 %v312_v42, %v865_v58 }
  0xc5   :  { %v275_v23 = vmul.f32 %v249_v21, %v249_v21  ;;  %v341_v42 = vand.u32 2147483648, %v874_v13 }
  0xc6   :  { %v878_v24 = vmax.f32 %v298_v19, 1e-07  ;;  %v322_v37 = vmul.f32 0.5, %v321_v27  ;;  %v315_v10 = vsel %vm314_vm0, %v865_v58, %v313_v54 }
  0xc7   :  { %v280_v26 = vadd.f32 %v275_v23, %v270_v20 }
  0xc8   :  { %737 = vrsqrt.f32 %v878_v24  ;;  %v323_v47 = vsub.f32 1.5, %v322_v37  ;;  %v389_v54 = vand.u32 2147483648, %v878_v24  ;;  %vm386_vm5 = vcmp.eq.f32.partialorder %v878_v24, inf }
  0xc9   :  { %v880_v28 = vmax.f32 %v280_v26, 1e-07  ;;  %v225_v29 = vpop.f32.mrf.mxu2  ;;  %v883_v30 = vpop.eup %735  ;;  %739 = vlog2.f32 %v865_v58  ;;  %vm388_vm8 = vcmp.eq.f32.partialorder %v878_v24, 0.0 }
  0xca   :  { %v289_v32 = vmul.f32 %v225_v29, %v225_v29  ;;  %v332_v38 = vmul.f32 %v883_v30, %v874_v13  ;;  %v264_v63 = vpop.f32.mrf.mxu3  ;;  %v324_v1 = vmul.f32 %v734_v15, %v323_v47 }
  0xcb   :  { %741 = vrsqrt.f32 %v880_v28  ;;  %v296_v14 = vmul.f32 %v264_v63, %v264_v63  ;;  %v353_v58 = vand.u32 2147483648, %v880_v28  ;;  %vm350_vm6 = vcmp.eq.f32.partialorder %v880_v28, inf }
  0xcc   :  { %v299_v35 = vadd.f32 %v294_v31, %v289_v32  ;;  %v252_v36 = vpop.f32.mrf.mxu1  ;;  %743 = vlog2.f32 %v868_v2  ;;  %v333_v48 = vmul.f32 %v883_v30, %v332_v38  ;;  %v325_v18 = vmul.f32 %v324_v1, %v868_v2 }
  0xcd   :  { %v276_v40 = vmul.f32 %v252_v36, %v252_v36  ;;  %745 = vlog2.f32 %v878_v24  ;;  %vm352_vm14 = vcmp.eq.f32.partialorder %v880_v28, 0.0 }
  0xce   :  { %v890_v41 = vmax.f32 %v299_v35, 1e-07  ;;  %v893_v43 = vpop.eup %737  ;;  %v334_v4 = vmul.f32 0.5, %v333_v48  ;;  %v327_v36 = vsel %vm326_vm2, %v868_v2, %v325_v18 }
  0xcf   :  { %v281_v44 = vadd.f32 %v276_v40, %v271_v39  ;;  %v740_v45 = vpop.eup %739  ;;  %v380_v51 = vmul.f32 %v893_v43, %v878_v24  ;;  %v951_v40 = vsel %vm316_vm1, %v317_v59, %v315_v10 }
  0xd0   :  { %747 = vlog2.f32 %v890_v41  ;;  %v909_v57 = vmul.f32 0.6931472, %v740_v45  ;;  %v335_v19 = vsub.f32 1.5, %v334_v4  ;;  %vm398_vm7 = vcmp.eq.f32.partialorder %v890_v41, inf }
  0xd1   :  { %v897_v49 = vmax.f32 %v281_v44, 1e-07  ;;  %v228_v50 = vpop.f32.mrf.mxu2  ;;  %749 = vrsqrt.f32 %v890_v41  ;;  %v902_v52 = vpop.eup %741  ;;  %v381_v6 = vmul.f32 %v893_v43, %v380_v51  ;;  %vm400_vm9 = vcmp.eq.f32.partialorder %v890_v41, 0.0 }
  0xd2   :  { %v290_v53 = vmul.f32 %v228_v50, %v228_v50  ;;  %751 = vlog2.f32 %v874_v13  ;;  %v744_v55 = vpop.eup %743  ;;  %v344_v60 = vmul.f32 %v902_v52, %v880_v28  ;;  %v336_v37 = vmul.f32 %v883_v30, %v335_v19 }
  0xd3   :  { %v746_v61 = vpop.eup %745  ;;  %753 = vrsqrt.f32 %v897_v49  ;;  %v445_v9 = vmul.f32 0.6931472, %v744_v55  ;;  %v382_v25 = vmul.f32 0.5, %v381_v6  ;;  %vm362_vm0 = vcmp.eq.f32.partialorder %v897_v49, inf }
  0xd4   :  { %v300_v62 = vadd.f32 %v295_v46, %v290_v53  ;;  %v254_v0 = vpop.f32.mrf.mxu1  ;;  %v345_v11 = vmul.f32 %v902_v52, %v344_v60  ;;  %v435_v16 = vmul.f32 0.6931472, %v746_v61  ;;  %755 = vlog2.f32 %v880_v28 }
  0xd5   :  { %v292_v5 = vmul.f32 %v254_v0, %v254_v0  ;;  %v383_v44 = vsub.f32 1.5, %v382_v25  ;;  %v959_v53 = vsel %vm328_vm3, %v329_v3, %v327_v36  ;;  %v337_v59 = vmul.f32 %v336_v37, %v874_v13 }
  0xd6   :  { %v748_v7 = vpop.eup %747  ;;  %v919_v8 = vmax.f32 %v300_v62, 1e-07  ;;  %v346_v29 = vmul.f32 0.5, %v345_v11  ;;  %v453_v33 = vsub.f32 %v435_v16, %v445_v9  ;;  %vm364_vm1 = vcmp.eq.f32.partialorder %v897_v49, 0.0 }
  0xd7   :  { %v926_v12 = vpop.eup %749  ;;  %v297_v15 = vadd.f32 %v292_v5, %v287_v56  ;;  %v437_v23 = vmul.f32 0.6931472, %v748_v7  ;;  %v384_v2 = vmul.f32 %v893_v43, %v383_v44 }
  0xd8   :  { %v752_v17 = vpop.eup %751  ;;  %757 = vlog2.f32 %v919_v8  ;;  %v392_v20 = vmul.f32 %v926_v12, %v890_v41  ;;  %v347_v47 = vsub.f32 1.5, %v346_v29  ;;  %v458_v30 = vand.u32 2147483647, %v453_v33 }
  0xd9   :  { %v933_v21 = vmax.f32 %v297_v15, 1e-07  ;;  %v230_v22 = vpop.f32.mrf.mxu2  ;;  %759 = vrsqrt.f32 %v919_v8  ;;  %v936_v26 = vpop.eup %753  ;;  %v447_v32 = vmul.f32 0.6931472, %v752_v17  ;;  %v385_v17 = vmul.f32 %v384_v2, %v878_v24 }
  0xda   :  { %v291_v27 = vmul.f32 %v230_v22, %v230_v22  ;;  %761 = vlog2.f32 %v897_v49  ;;  %v393_v31 = vmul.f32 %v926_v12, %v392_v20  ;;  %v356_v34 = vmul.f32 %v936_v26, %v897_v49  ;;  %v756_v38 = vpop.eup %755 }
  0xdb   :  { %763 = vlog2.f32 %v933_v21  ;;  %v454_v39 = vsub.f32 %v437_v23, %v447_v32  ;;  %v449_v62 = vmul.f32 0.6931472, %v756_v38  ;;  %v348_v5 = vmul.f32 %v902_v52, %v347_v47 }
  0xdc   :  { %v301_v35 = vadd.f32 %v296_v14, %v291_v27  ;;  %765 = vrsqrt.f32 %v933_v21  ;;  %v357_v48 = vmul.f32 %v936_v26, %v356_v34  ;;  %v394_v50 = vmul.f32 0.5, %v393_v31 }
  0xdd   :  { %v459_v63 = vand.u32 2147483647, %v454_v39  ;;  %v463_v6 = vmul.f32 0.5, %v458_v30  ;;  %v339_v52 = vsel %vm338_vm4, %v874_v13, %v337_v59  ;;  %v401_v14 = vand.u32 2147483648, %v890_v41 }
  0xde   :  { %v758_v45 = vpop.eup %757  ;;  %v954_v46 = vmax.f32 %v301_v35, 1e-07  ;;  %v395_v60 = vsub.f32 1.5, %v394_v50  ;;  %v358_v3 = vmul.f32 0.5, %v357_v48  ;;  %v349_v22 = vmul.f32 %v348_v5, %v880_v28 }
  0xdf   :  { %v760_v51 = vpop.eup %759  ;;  %v439_v56 = vmul.f32 0.6931472, %v758_v45  ;;  %vm374_vm10 = vcmp.eq.f32.partialorder %v933_v21, inf  ;;  %vm376_vm12 = vcmp.eq.f32.partialorder %v933_v21, 0.0  ;;  %v377_v27 = vand.u32 2147483648, %v933_v21 }
  0xe0   :  { %v762_v55 = vpop.eup %761  ;;  %767 = vlog2.f32 %v954_v46  ;;  %v404_v0 = vmul.f32 %v760_v51, %v919_v8  ;;  %v396_v9 = vmul.f32 %v926_v12, %v395_v60  ;;  %v464_v12 = vmul.f32 0.5, %v459_v63 }
  0xe1   :  { %v764_v61 = vpop.eup %763  ;;  %769 = vrsqrt.f32 %v954_v46  ;;  %v455_v11 = vsub.f32 %v439_v56, %v449_v62  ;;  %v451_v15 = vmul.f32 0.6931472, %v762_v55  ;;  %vm410_vm13 = vcmp.eq.f32.partialorder %v919_v8, inf }
  0xe2   :  { %v766_v1 = vpop.eup %765  ;;  %v433_v4 = vmul.f32 0.6931472, %v764_v61  ;;  %v405_v10 = vmul.f32 %v760_v51, %v404_v0  ;;  %v397_v29 = vmul.f32 %v396_v9, %v890_v41  ;;  %v387_v37 = vsel %vm386_vm5, %v878_v24, %v385_v17 }
  0xe3   :  { %v368_v7 = vmul.f32 %v766_v1, %v933_v21  ;;  %v460_v32 = vand.u32 2147483647, %v455_v11  ;;  %v351_v44 = vsel %vm350_vm6, %v880_v28, %v349_v22  ;;  %v390_v60 = vsel %vm388_vm8, %v389_v54, %v387_v37 }
  0xe4   :  { %v452_v43 = vsub.f32 %v433_v4, %v909_v57  ;;  %v406_v18 = vmul.f32 0.5, %v405_v10  ;;  %v359_v57 = vsub.f32 1.5, %v358_v3  ;;  %v399_v30 = vsel %vm398_vm7, %v890_v41, %v397_v29 }
  0xe5   :  { %v369_v16 = vmul.f32 %v766_v1, %v368_v7  ;;  %v465_v56 = vmul.f32 0.5, %v460_v32  ;;  %vm412_vm15 = vcmp.eq.f32.partialorder %v919_v8, 0.0  ;;  %v428_v3 = vsub.f32 %v390_v60, %v959_v53 }
  0xe6   :  { %v768_v19 = vpop.eup %767  ;;  %v457_v20 = vand.u32 2147483647, %v452_v43  ;;  %v407_v34 = vsub.f32 1.5, %v406_v18  ;;  %v360_v45 = vmul.f32 %v936_v26, %v359_v57  ;;  %v342_v7 = vsel %vm340_vm11, %v341_v42, %v339_v52 }
  0xe7   :  { %v441_v23 = vmul.f32 0.6931472, %v768_v19  ;;  %v370_v25 = vmul.f32 0.5, %v369_v16  ;;  %v770_v31 = vpop.eup %769  ;;  %v354_v53 = vsel %vm352_vm14, %v353_v58, %v351_v44  ;;  %v473_v16 = vmul.f32 %v428_v3, %v428_v3 }
  0xe8   :  { %v462_v33 = vmul.f32 0.5, %v457_v20  ;;  %v416_v38 = vmul.f32 %v770_v31, %v954_v46  ;;  %v408_v47 = vmul.f32 %v760_v51, %v407_v34  ;;  %v413_v51 = vand.u32 2147483648, %v919_v8 }
  0xe9   :  { %v456_v35 = vsub.f32 %v441_v23, %v451_v15  ;;  %v371_v36 = vsub.f32 1.5, %v370_v25  ;;  %v361_v0 = vmul.f32 %v360_v45, %v897_v49  ;;  %v365_v17 = vand.u32 2147483648, %v897_v49 }
  0xea   :  { %v565_v39 = vadd.f32 %v463_v6, %v462_v33  ;;  %v417_v55 = vmul.f32 %v770_v31, %v416_v38  ;;  %v409_v61 = vmul.f32 %v408_v47, %v919_v8  ;;  %vm422_vm2 = vcmp.eq.f32.partialorder %v954_v46, inf }
  0xeb   :  { %v461_v48 = vand.u32 2147483647, %v456_v35  ;;  %v372_v50 = vmul.f32 %v766_v1, %v371_v36  ;;  %v402_v1 = vsel %vm400_vm9, %v401_v14, %v399_v30  ;;  %v363_v15 = vsel %vm362_vm0, %v897_v49, %v361_v0 }
  0xec   :  { %v566_v59 = vadd.f32 %v565_v39, %v464_v12  ;;  %v418_v63 = vmul.f32 0.5, %v417_v55  ;;  %v411_v4 = vsel %vm410_vm13, %v919_v8, %v409_v61  ;;  %v429_v14 = vsub.f32 %v402_v1, %v342_v7 }
  0xed   :  { %v466_v62 = vmul.f32 0.5, %v461_v48  ;;  %v373_v26 = vmul.f32 %v372_v50, %v933_v21  ;;  %v414_v10 = vsel %vm412_vm15, %v413_v51, %v411_v4  ;;  %vm424_vm3 = vcmp.eq.f32.partialorder %v954_v46, 0.0 }
  0xee   :  { %v567_v2 = vadd.f32 %v566_v59, %v465_v56  ;;  %v419_v5 = vsub.f32 1.5, %v418_v63  ;;  %v430_v42 = vsub.f32 %v414_v10, %v354_v53  ;;  %v474_v28 = vmul.f32 %v429_v14, %v429_v14 }
  0xef   :  { %v375_v54 = vsel %vm374_vm10, %v933_v21, %v373_v26  ;;  %v366_v19 = vsel %vm364_vm1, %v365_v17, %v363_v15  ;;  %v545_v23 = vadd.f32 %v878_v24, %v933_v21 }
  0xf0   :  { %v568_v6 = vadd.f32 %v567_v2, %v466_v62  ;;  %v378_v9 = vsel %vm376_vm12, %v377_v27, %v375_v54  ;;  %v420_v43 = vmul.f32 %v770_v31, %v419_v5  ;;  %v475_v22 = vmul.f32 %v430_v42, %v430_v42 }
  0xf1   :  { %v427_v11 = vsub.f32 %v378_v9, %v951_v40  ;;  %v425_v40 = vand.u32 2147483648, %v954_v46  ;;  %v546_v29 = vadd.f32 %v545_v23, %v890_v41 }
  0xf2   :  { %569 = vadd.xlane.f32.xlu1 %v568_v6  ;;  %v421_v13 = vmul.f32 %v420_v43, %v954_v46 }
  0xf3   :  { %v472_v52 = vmul.f32 %v427_v11, %v427_v11  ;;  %v547_v31 = vadd.f32 %v546_v29, %v919_v8 }
  0xf4   :  { %v423_v18 = vsel %vm422_vm2, %v954_v46, %v421_v13 }
  0xf5   :  { %v525_v58 = vadd.f32 %v473_v16, %v472_v52  ;;  %v426_v20 = vsel %vm424_vm3, %v425_v40, %v423_v18  ;;  %v548_v32 = vadd.f32 %v547_v31, %v954_v46 }
  0xf6   :  { %v431_v12 = vsub.f32 %v426_v20, %v366_v19 }
  0xf7   :  { %v526_v57 = vadd.f32 %v525_v58, %v474_v28 }
  0xf8   :  { %v476_v25 = vmul.f32 %v431_v12, %v431_v12 }
  0xf9   :  { %v527_v49 = vadd.f32 %v526_v57, %v475_v22 }
  0xfb   :  { %v528_v27 = vadd.f32 %v527_v49, %v476_v25 }
  0xfd   :  { %529 = vadd.xlane.f32.xlu0 %v528_v27 }
 0x105   :  { %549 = vadd.xlane.f32.xlu0 %v548_v32 }
 0x165   :  { %v570_v33 = vpop.xlane.xlu1 %569 }
 0x166   :  { %v571_v34 = vrot.slane %v570_v33, 4 }
 0x168   :  { %v572_v38 = vadd.f32 %v571_v34, %v570_v33 }
 0x16a   :  { %v573_v24 = vrot.slane %v572_v38, 2 }
 0x16c   :  { %v574_v50 = vadd.f32 %v573_v24, %v572_v38 }
 0x16e   :  { %v575_v46 = vrot.slane %v574_v50, 1 }
 0x170   :  { %v530_v35 = vpop.xlane.xlu0 %529  ;;  %v576_v59 = vadd.f32 %v575_v46, %v574_v50 }
 0x171   :  { %v531_v36 = vrot.slane %v530_v35, 4 }
 0x173   :  { %v532_v37 = vadd.f32 %v531_v36, %v530_v35 }
 0x175   :  { %v533_v39 = vrot.slane %v532_v37, 2 }
 0x177   :  { %v534_v44 = vadd.f32 %v533_v39, %v532_v37 }
 0x178   :  { %v550_v21 = vpop.xlane.xlu0 %549 }
 0x179   :  { %v551_v45 = vrot.slane %v550_v21, 4  ;;  %v535_v47 = vrot.slane %v534_v44, 1 }
 0x17b   :  { %v552_v48 = vadd.f32 %v551_v45, %v550_v21  ;;  %v536_v41 = vadd.f32 %v535_v47, %v534_v44 }
 0x17d   :  { %v553_v30 = vrot.slane %v552_v48, 2  ;;  %718 = vpush %v536_v41 }
 0x17f   :  { %v554_v8 = vadd.f32 %v553_v30, %v552_v48 }
 0x181   :  { %v555_v55 = vrot.slane %v554_v8, 1 }
 0x183   :  { %v556_v56 = vadd.f32 %v555_v55, %v554_v8 }
 0x185   :  { %720 = vpush %v556_v56 }
 0x186   :  { %722 = vpush %v576_v59 }
 0x1ae   :  { %s719_s0 = spop %718 }
 0x1af   :  { %539 = sst [smem:[#allocation10]] %s719_s0 }
 0x1b6   :  { %s721_s25 = spop %720 }
 0x1b7   :  { %559 = sst [smem:[#allocation10 + $0x1]] %s721_s25  ;;  %s723_s26 = spop %722 }
 0x1b8   :  { %579 = sst [smem:[#allocation10 + $0x2]] %s723_s26 }
 0x1b9   :  { %588 = dma.smem_to_hbm %s843_s27, 16, %s586_s24, [#allocation7]  }
 0x1ba   :  { %835 = dma.done.wait [#allocation7], 16  }
 0x1bb   :  { %836 = vsyncadd [#allocation7], 4294967280 }
 0x1bc   :  { %593 = sfence }
 0x1bd   :  { %594 = vsyncpa [#allocation6], 1 }
 0x1be   :  { %595 = vsyncpa [#allocation9], 1 }
 0x1bf   :  { %596 = vsyncpa [#allocation7], 1 }

</bundles_post_ra>
